<compile_context>
chip_gen: v7x
topology: tpu7x:2x2x1
jax: 0.10.0
libtpu: 0.0.40
codegen_flags: <defaults>
</compile_context>

<pallas_src>
import functools

import numpy as np
import jax
import jax.numpy as jnp
from jax import lax
from jax.experimental import pallas as pl
from jax.experimental.pallas import tpu as pltpu


# --------------------------------------------------------------------------
# helpers
# --------------------------------------------------------------------------
def _round_up(v, m):
    return (v + m - 1) // m * m


def _pick_tile(dim, candidates):
    for c in candidates:
        if c <= dim and dim % c == 0:
            return c
    return dim


# --------------------------------------------------------------------------
# one-shot kernel: build the (S, P) bilinear sampling matrix from the grid
# --------------------------------------------------------------------------
def _build_wsample_kernel(gx_ref, gy_ref, w_ref, *, H, W, TS):
    # gx_ref, gy_ref : (1, TP)  grid x (width) / y (height) coords in [-1, 1]
    # w_ref          : (TS, TP) tile of the sampling matrix (rows = flat pixel)
    gx = gx_ref[...]
    gy = gy_ref[...]

    # Un-normalize (align_corners=False):  ix = ((g + 1) * size - 1) / 2
    ix = ((gx + 1.0) * W - 1.0) * 0.5
    iy = ((gy + 1.0) * H - 1.0) * 0.5

    x0f = jnp.floor(ix)
    y0f = jnp.floor(iy)
    x0 = x0f.astype(jnp.int32)
    y0 = y0f.astype(jnp.int32)
    x1 = x0 + 1
    y1 = y0 + 1

    wx1 = ix - x0f
    wx0 = 1.0 - wx1
    wy1 = iy - y0f
    wy0 = 1.0 - wy1

    # Row index of this tile within the full (padded) S axis.
    s_base = pl.program_id(0) * TS
    s_iota = lax.broadcasted_iota(jnp.int32, (TS, 1), 0) + s_base   # (TS, 1)

    def corner(acc, xc, yc, w):
        # zeros padding: out-of-bounds corners contribute nothing.  NOTE: an
        # OOB corner's flat index may alias an in-range pixel; the masked
        # weight (wv == 0) is what keeps that from sampling a wrapped pixel.
        valid = (xc >= 0) & (xc < W) & (yc >= 0) & (yc < H)        # (1, TP)
        idx = yc * W + xc                                          # (1, TP)
        wv = jnp.where(valid, w, 0.0)                              # (1, TP)
        return acc + jnp.where(s_iota == idx, wv, 0.0)             # (TS, TP)

    acc = jnp.zeros(w_ref.shape, jnp.float32)
    acc = corner(acc, x0, y0, wx0 * wy0)
    acc = corner(acc, x1, y0, wx1 * wy0)
    acc = corner(acc, x0, y1, wx0 * wy1)
    acc = corner(acc, x1, y1, wx1 * wy1)
    w_ref[...] = acc.astype(w_ref.dtype)


def build_sampling_matrix(gx, gy, H, W, dtype=jnp.bfloat16):
    """Returns (w_sample[(S_pad, P_pad)], P) for input spatial size (H, W)."""
    Ho, Wo = gx.shape
    P = Ho * Wo
    S = H * W
    P_pad = _round_up(P, 128)
    S_pad = _round_up(S, 128)
    tp = _pick_tile(P_pad, (512, 384, 256, 128))
    ts = _pick_tile(S_pad, (1024, 512, 384, 256, 128))

    pad = P_pad - P
    # Padded grid entries use -2.0: all four corners land out of bounds, so the
    # corresponding columns of w_sample are exactly zero (and are sliced away).
    gxf = jnp.pad(gx.reshape(1, P).astype(jnp.float32),
                  ((0, 0), (0, pad)), constant_values=-2.0)
    gyf = jnp.pad(gy.reshape(1, P).astype(jnp.float32),
                  ((0, 0), (0, pad)), constant_values=-2.0)

    kernel = functools.partial(_build_wsample_kernel, H=H, W=W, TS=ts)
    w = pl.pallas_call(
        kernel,
        out_shape=jax.ShapeDtypeStruct((S_pad, P_pad), dtype),
        grid=(S_pad // ts, P_pad // tp),
        in_specs=[
            pl.BlockSpec((1, tp), lambda i, j: (0, j)),
            pl.BlockSpec((1, tp), lambda i, j: (0, j)),
        ],
        out_specs=pl.BlockSpec((ts, tp), lambda i, j: (i, j)),
        compiler_params=pltpu.CompilerParams(
            dimension_semantics=("parallel", "parallel"),
            vmem_limit_bytes=48 * 1024 * 1024),
    )(gxf, gyf)
    return w, P


# --------------------------------------------------------------------------
# hot-path kernel: tiled (M, S) @ (S, P) matmul with f32 accumulation
# --------------------------------------------------------------------------
def _matmul_kernel(x_ref, w_ref, o_ref, acc_ref):
    @pl.when(pl.program_id(2) == 0)
    def _():
        acc_ref[...] = jnp.zeros_like(acc_ref)

    acc_ref[...] += jnp.dot(x_ref[...], w_ref[...],
                            preferred_element_type=jnp.float32)

    @pl.when(pl.program_id(2) == pl.num_programs(2) - 1)
    def _():
        o_ref[...] = acc_ref[...].astype(o_ref.dtype)


def sample_apply(x, w_sample, P, Ho, Wo):
    """x: (N, C, H, W); w_sample: (S_pad, P_pad). Returns (N, C, Ho, Wo) f32."""
    N, C, H, W = x.shape
    S = H * W
    S_pad, P_pad = w_sample.shape
    M = N * C
    M_pad = _round_up(M, 8)

    # Fold N and C into the matmul M dimension; pad rows/cols with zeros.
    x2 = x.reshape(M, S).astype(w_sample.dtype)
    x2 = jnp.pad(x2, ((0, M_pad - M), (0, S_pad - S)))

    tm = _pick_tile(M_pad, (256, 128, 64, 32, 16, 8))
    tp = _pick_tile(P_pad, (512, 384, 256, 128))
    ts = _pick_tile(S_pad, (2048, 1024, 512, 384, 256, 128))

    out = pl.pallas_call(
        _matmul_kernel,
        out_shape=jax.ShapeDtypeStruct((M_pad, P_pad), jnp.float32),
        grid=(M_pad // tm, P_pad // tp, S_pad // ts),
        in_specs=[
            pl.BlockSpec((tm, ts), lambda i, j, k: (i, k)),
            pl.BlockSpec((ts, tp), lambda i, j, k: (k, j)),
        ],
        out_specs=pl.BlockSpec((tm, tp), lambda i, j, k: (i, j)),
        scratch_shapes=[pltpu.VMEM((tm, tp), jnp.float32)],
        compiler_params=pltpu.CompilerParams(
            dimension_semantics=("parallel", "parallel", "arbitrary"),
            vmem_limit_bytes=48 * 1024 * 1024),
    )(x2, w_sample)

    return out[:M, :P].reshape(N, C, Ho, Wo)


# --------------------------------------------------------------------------
# module
# --------------------------------------------------------------------------
def make_p2c_grid(cart_shape):
    """Deterministic parameter init -- identical math to the PyTorch __init__."""
    i = np.linspace(-1, 1, cart_shape)
    j = np.linspace(-1, 1, cart_shape)
    I, J = np.meshgrid(i, j)
    A = -np.arctan2(I, J) / np.pi                 # y-coordinate of the grid
    R = np.sqrt(I ** 2 + J ** 2)
    R = R / (R.max() / np.sqrt(2))
    R = 2.0 * R - 1.0                             # x-coordinate of the grid
    gx = jnp.asarray(R, dtype=jnp.float32)        # grid[..., 0]
    gy = jnp.asarray(A, dtype=jnp.float32)        # grid[..., 1]
    return gx, gy


class P2C:
    """JAX/Pallas port of the PyTorch P2C module (forward = grid_sample(x, grid)).

    The grid parameter has batch 1 (as in the PyTorch module); it is shared
    (broadcast) across the input batch.  The (S, P) sampling matrix is built
    once per input spatial size and cached, so repeated forward calls only run
    the matmul kernel.
    """

    def __init__(self, cart_shape=16, precision="bf16"):
        self.gx, self.gy = make_p2c_grid(cart_shape)
        self.cart_shape = cart_shape
        # bf16 MXU operands with f32 accumulation (~1e-3 rel diff vs f32);
        # pass precision="f32" for exact-f32 matmul operands.
        self._w_dtype = jnp.bfloat16 if precision == "bf16" else jnp.float32
        self._w_cache = {}     # (H, W) -> (w_sample, P)

    def _get_w(self, H, W):
        key = (H, W)
        if key not in self._w_cache:
            self._w_cache[key] = build_sampling_matrix(
                self.gx, self.gy, H, W, dtype=self._w_dtype)
        return self._w_cache[key]

    def __call__(self, x):
        N, C, H, W = x.shape
        w_sample, P = self._get_w(H, W)
        return sample_apply(x.astype(jnp.float32), w_sample, P,
                            self.cart_shape, self.cart_shape)

# TODO(synk): for very small N*C a direct 4-corner gather + VPU lerp (no (S,P)
# matrix at all) would use ~S/4x less MXU work; kept the matmul form for
# robustness of lowering and because the sampling matrix is now built once.


# --------------------------------------------------------------------------
# pure-JAX reference (bilinear, zeros padding, align_corners=False)
# --------------------------------------------------------------------------
def _grid_sample_ref(x, gx, gy):
    N, C, H, W = x.shape
    ix = ((gx + 1.0) * W - 1.0) * 0.5
    iy = ((gy + 1.0) * H - 1.0) * 0.5
    x0 = jnp.floor(ix)
    y0 = jnp.floor(iy)
    x1 = x0 + 1.0
    y1 = y0 + 1.0
    wx1 = ix - x0
    wx0 = 1.0 - wx1
    wy1 = iy - y0
    wy0 = 1.0 - wy1

    def tap(xc, yc, w):
        valid = (xc >= 0) & (xc <= W - 1) & (yc >= 0) & (yc <= H - 1)
        xi = jnp.clip(xc, 0, W - 1).astype(jnp.int32)
        yi = jnp.clip(yc, 0, H - 1).astype(jnp.int32)
        v = x[:, :, yi, xi]                       # (N, C, Ho, Wo)
        w_eff = jnp.where(valid, w, 0.0)          # (Ho, Wo)
        return v * w_eff[None, None]

    return (tap(x0, y0, wx0 * wy0) + tap(x1, y0, wx1 * wy0)
            + tap(x0, y1, wx0 * wy1) + tap(x1, y1, wx1 * wy1))


if __name__ == "__main__":
    key = jax.random.PRNGKey(0)
    # Batch 2 (grid is broadcast per-sample), channels=4, 16x16 input,
    # cart_shape=16 output grid.
    N, C, H, W = 2, 4, 16, 16
    cart_shape = 16

    x = jax.random.normal(key, (N, C, H, W), dtype=jnp.float32)

    model = P2C(cart_shape=cart_shape, precision="bf16")
    out = jax.block_until_ready(model(x))

    assert out.shape == (N, C, cart_shape, cart_shape), out.shape
    assert out.dtype == jnp.float32
    assert bool(jnp.all(jnp.isfinite(out)))

    ref = _grid_sample_ref(x, model.gx, model.gy)
    max_err = float(jnp.max(jnp.abs(out - ref)))
    assert max_err < 5e-2, f"max abs error vs reference = {max_err}"

    print("KERNEL_OK")
</pallas_src>

<mosaic_0001>
module attributes {stable_mosaic.version = 11 : i64} {
  func.func @_build_wsample_kernel(%arg0: i32, %arg1: i32, %arg2: memref<1x256xf32, #tpu.memory_space<vmem>>, %arg3: memref<1x256xf32, #tpu.memory_space<vmem>>, %arg4: memref<256x256xbf16, #tpu.memory_space<vmem>>) attributes {dimension_semantics = [#tpu.dimension_semantics<parallel>, #tpu.dimension_semantics<parallel>], iteration_bounds = array<i64: 1, 1>, scalar_prefetch = 0 : i64, scratch_operands = 0 : i64, tpu.core_type = #tpu.core_type<tc>, window_params = [{transform_indices = @transform_0, window_bounds = array<i64: 1, 256>}, {transform_indices = @transform_1, window_bounds = array<i64: 1, 256>}, {transform_indices = @transform_2, window_bounds = array<i64: 256, 256>}]} {
    %c0 = arith.constant 0 : index
    %c0_0 = arith.constant 0 : index
    %0 = vector.load %arg2[%c0, %c0_0] : memref<1x256xf32, #tpu.memory_space<vmem>>, vector<1x256xf32>
    %c0_1 = arith.constant 0 : index
    %c0_2 = arith.constant 0 : index
    %1 = vector.load %arg3[%c0_1, %c0_2] : memref<1x256xf32, #tpu.memory_space<vmem>>, vector<1x256xf32>
    %cst = arith.constant 1.000000e+00 : f32
    %2 = vector.broadcast %cst : f32 to vector<1x256xf32>
    %3 = arith.addf %0, %2 : vector<1x256xf32>
    %cst_3 = arith.constant 1.600000e+01 : f32
    %4 = vector.broadcast %cst_3 : f32 to vector<1x256xf32>
    %5 = arith.mulf %3, %4 : vector<1x256xf32>
    %cst_4 = arith.constant 1.000000e+00 : f32
    %6 = vector.broadcast %cst_4 : f32 to vector<1x256xf32>
    %7 = arith.subf %5, %6 : vector<1x256xf32>
    %cst_5 = arith.constant 5.000000e-01 : f32
    %8 = vector.broadcast %cst_5 : f32 to vector<1x256xf32>
    %9 = arith.mulf %7, %8 : vector<1x256xf32>
    %cst_6 = arith.constant 1.000000e+00 : f32
    %10 = vector.broadcast %cst_6 : f32 to vector<1x256xf32>
    %11 = arith.addf %1, %10 : vector<1x256xf32>
    %cst_7 = arith.constant 1.600000e+01 : f32
    %12 = vector.broadcast %cst_7 : f32 to vector<1x256xf32>
    %13 = arith.mulf %11, %12 : vector<1x256xf32>
    %cst_8 = arith.constant 1.000000e+00 : f32
    %14 = vector.broadcast %cst_8 : f32 to vector<1x256xf32>
    %15 = arith.subf %13, %14 : vector<1x256xf32>
    %cst_9 = arith.constant 5.000000e-01 : f32
    %16 = vector.broadcast %cst_9 : f32 to vector<1x256xf32>
    %17 = arith.mulf %15, %16 : vector<1x256xf32>
    %18 = math.floor %9 : vector<1x256xf32>
    %19 = math.floor %17 : vector<1x256xf32>
    %20 = arith.fptosi %18 : vector<1x256xf32> to vector<1x256xi32>
    %21 = arith.fptosi %19 : vector<1x256xf32> to vector<1x256xi32>
    %c1_i32 = arith.constant 1 : i32
    %22 = vector.broadcast %c1_i32 : i32 to vector<1x256xi32>
    %23 = arith.addi %20, %22 : vector<1x256xi32>
    %c1_i32_10 = arith.constant 1 : i32
    %24 = vector.broadcast %c1_i32_10 : i32 to vector<1x256xi32>
    %25 = arith.addi %21, %24 : vector<1x256xi32>
    %26 = arith.subf %9, %18 : vector<1x256xf32>
    %cst_11 = arith.constant 1.000000e+00 : f32
    %27 = vector.broadcast %cst_11 : f32 to vector<1x256xf32>
    %28 = arith.subf %27, %26 : vector<1x256xf32>
    %29 = arith.subf %17, %19 : vector<1x256xf32>
    %cst_12 = arith.constant 1.000000e+00 : f32
    %30 = vector.broadcast %cst_12 : f32 to vector<1x256xf32>
    %31 = arith.subf %30, %29 : vector<1x256xf32>
    %c256_i32 = arith.constant 256 : i32
    %32 = arith.muli %arg0, %c256_i32 : i32
    %33 = tpu.iota {dimensions = array<i32: 0>} : vector<256x1xi32>
    %34 = vector.broadcast %32 : i32 to vector<256x1xi32>
    %35 = arith.addi %33, %34 : vector<256x1xi32>
    %cst_13 = arith.constant 0.000000e+00 : f32
    %36 = vector.broadcast %cst_13 : f32 to vector<256x256xf32>
    %37 = arith.mulf %28, %31 : vector<1x256xf32>
    %c0_i32 = arith.constant 0 : i32
    %38 = vector.broadcast %c0_i32 : i32 to vector<1x256xi32>
    %39 = arith.cmpi sge, %20, %38 : vector<1x256xi32>
    %c16_i32 = arith.constant 16 : i32
    %40 = vector.broadcast %c16_i32 : i32 to vector<1x256xi32>
    %41 = arith.cmpi slt, %20, %40 : vector<1x256xi32>
    %42 = arith.andi %39, %41 : vector<1x256xi1>
    %c0_i32_14 = arith.constant 0 : i32
    %43 = vector.broadcast %c0_i32_14 : i32 to vector<1x256xi32>
    %44 = arith.cmpi sge, %21, %43 : vector<1x256xi32>
    %45 = arith.andi %42, %44 : vector<1x256xi1>
    %c16_i32_15 = arith.constant 16 : i32
    %46 = vector.broadcast %c16_i32_15 : i32 to vector<1x256xi32>
    %47 = arith.cmpi slt, %21, %46 : vector<1x256xi32>
    %48 = arith.andi %45, %47 : vector<1x256xi1>
    %c16_i32_16 = arith.constant 16 : i32
    %49 = vector.broadcast %c16_i32_16 : i32 to vector<1x256xi32>
    %50 = arith.muli %21, %49 : vector<1x256xi32>
    %51 = arith.addi %50, %20 : vector<1x256xi32>
    %cst_17 = arith.constant 0.000000e+00 : f32
    %52 = vector.broadcast %cst_17 : f32 to vector<1x256xf32>
    %53 = arith.select %48, %37, %52 : vector<1x256xi1>, vector<1x256xf32>
    %54 = vector.broadcast %35 : vector<256x1xi32> to vector<256x256xi32>
    %55 = vector.broadcast %51 : vector<1x256xi32> to vector<256x256xi32>
    %56 = arith.cmpi eq, %54, %55 : vector<256x256xi32>
    %cst_18 = arith.constant 0.000000e+00 : f32
    %57 = vector.shape_cast %53 : vector<1x256xf32> to vector<1x256xf32>
    %58 = vector.broadcast %57 : vector<1x256xf32> to vector<256x256xf32>
    %59 = vector.broadcast %cst_18 : f32 to vector<256x256xf32>
    %60 = arith.select %56, %58, %59 : vector<256x256xi1>, vector<256x256xf32>
    %61 = arith.addf %36, %60 : vector<256x256xf32>
    %62 = arith.mulf %26, %31 : vector<1x256xf32>
    %c0_i32_19 = arith.constant 0 : i32
    %63 = vector.broadcast %c0_i32_19 : i32 to vector<1x256xi32>
    %64 = arith.cmpi sge, %23, %63 : vector<1x256xi32>
    %c16_i32_20 = arith.constant 16 : i32
    %65 = vector.broadcast %c16_i32_20 : i32 to vector<1x256xi32>
    %66 = arith.cmpi slt, %23, %65 : vector<1x256xi32>
    %67 = arith.andi %64, %66 : vector<1x256xi1>
    %c0_i32_21 = arith.constant 0 : i32
    %68 = vector.broadcast %c0_i32_21 : i32 to vector<1x256xi32>
    %69 = arith.cmpi sge, %21, %68 : vector<1x256xi32>
    %70 = arith.andi %67, %69 : vector<1x256xi1>
    %c16_i32_22 = arith.constant 16 : i32
    %71 = vector.broadcast %c16_i32_22 : i32 to vector<1x256xi32>
    %72 = arith.cmpi slt, %21, %71 : vector<1x256xi32>
    %73 = arith.andi %70, %72 : vector<1x256xi1>
    %c16_i32_23 = arith.constant 16 : i32
    %74 = vector.broadcast %c16_i32_23 : i32 to vector<1x256xi32>
    %75 = arith.muli %21, %74 : vector<1x256xi32>
    %76 = arith.addi %75, %23 : vector<1x256xi32>
    %cst_24 = arith.constant 0.000000e+00 : f32
    %77 = vector.broadcast %cst_24 : f32 to vector<1x256xf32>
    %78 = arith.select %73, %62, %77 : vector<1x256xi1>, vector<1x256xf32>
    %79 = vector.broadcast %35 : vector<256x1xi32> to vector<256x256xi32>
    %80 = vector.broadcast %76 : vector<1x256xi32> to vector<256x256xi32>
    %81 = arith.cmpi eq, %79, %80 : vector<256x256xi32>
    %cst_25 = arith.constant 0.000000e+00 : f32
    %82 = vector.shape_cast %78 : vector<1x256xf32> to vector<1x256xf32>
    %83 = vector.broadcast %82 : vector<1x256xf32> to vector<256x256xf32>
    %84 = vector.broadcast %cst_25 : f32 to vector<256x256xf32>
    %85 = arith.select %81, %83, %84 : vector<256x256xi1>, vector<256x256xf32>
    %86 = arith.addf %61, %85 : vector<256x256xf32>
    %87 = arith.mulf %28, %29 : vector<1x256xf32>
    %c0_i32_26 = arith.constant 0 : i32
    %88 = vector.broadcast %c0_i32_26 : i32 to vector<1x256xi32>
    %89 = arith.cmpi sge, %20, %88 : vector<1x256xi32>
    %c16_i32_27 = arith.constant 16 : i32
    %90 = vector.broadcast %c16_i32_27 : i32 to vector<1x256xi32>
    %91 = arith.cmpi slt, %20, %90 : vector<1x256xi32>
    %92 = arith.andi %89, %91 : vector<1x256xi1>
    %c0_i32_28 = arith.constant 0 : i32
    %93 = vector.broadcast %c0_i32_28 : i32 to vector<1x256xi32>
    %94 = arith.cmpi sge, %25, %93 : vector<1x256xi32>
    %95 = arith.andi %92, %94 : vector<1x256xi1>
    %c16_i32_29 = arith.constant 16 : i32
    %96 = vector.broadcast %c16_i32_29 : i32 to vector<1x256xi32>
    %97 = arith.cmpi slt, %25, %96 : vector<1x256xi32>
    %98 = arith.andi %95, %97 : vector<1x256xi1>
    %c16_i32_30 = arith.constant 16 : i32
    %99 = vector.broadcast %c16_i32_30 : i32 to vector<1x256xi32>
    %100 = arith.muli %25, %99 : vector<1x256xi32>
    %101 = arith.addi %100, %20 : vector<1x256xi32>
    %cst_31 = arith.constant 0.000000e+00 : f32
    %102 = vector.broadcast %cst_31 : f32 to vector<1x256xf32>
    %103 = arith.select %98, %87, %102 : vector<1x256xi1>, vector<1x256xf32>
    %104 = vector.broadcast %35 : vector<256x1xi32> to vector<256x256xi32>
    %105 = vector.broadcast %101 : vector<1x256xi32> to vector<256x256xi32>
    %106 = arith.cmpi eq, %104, %105 : vector<256x256xi32>
    %cst_32 = arith.constant 0.000000e+00 : f32
    %107 = vector.shape_cast %103 : vector<1x256xf32> to vector<1x256xf32>
    %108 = vector.broadcast %107 : vector<1x256xf32> to vector<256x256xf32>
    %109 = vector.broadcast %cst_32 : f32 to vector<256x256xf32>
    %110 = arith.select %106, %108, %109 : vector<256x256xi1>, vector<256x256xf32>
    %111 = arith.addf %86, %110 : vector<256x256xf32>
    %112 = arith.mulf %26, %29 : vector<1x256xf32>
    %c0_i32_33 = arith.constant 0 : i32
    %113 = vector.broadcast %c0_i32_33 : i32 to vector<1x256xi32>
    %114 = arith.cmpi sge, %23, %113 : vector<1x256xi32>
    %c16_i32_34 = arith.constant 16 : i32
    %115 = vector.broadcast %c16_i32_34 : i32 to vector<1x256xi32>
    %116 = arith.cmpi slt, %23, %115 : vector<1x256xi32>
    %117 = arith.andi %114, %116 : vector<1x256xi1>
    %c0_i32_35 = arith.constant 0 : i32
    %118 = vector.broadcast %c0_i32_35 : i32 to vector<1x256xi32>
    %119 = arith.cmpi sge, %25, %118 : vector<1x256xi32>
    %120 = arith.andi %117, %119 : vector<1x256xi1>
    %c16_i32_36 = arith.constant 16 : i32
    %121 = vector.broadcast %c16_i32_36 : i32 to vector<1x256xi32>
    %122 = arith.cmpi slt, %25, %121 : vector<1x256xi32>
    %123 = arith.andi %120, %122 : vector<1x256xi1>
    %c16_i32_37 = arith.constant 16 : i32
    %124 = vector.broadcast %c16_i32_37 : i32 to vector<1x256xi32>
    %125 = arith.muli %25, %124 : vector<1x256xi32>
    %126 = arith.addi %125, %23 : vector<1x256xi32>
    %cst_38 = arith.constant 0.000000e+00 : f32
    %127 = vector.broadcast %cst_38 : f32 to vector<1x256xf32>
    %128 = arith.select %123, %112, %127 : vector<1x256xi1>, vector<1x256xf32>
    %129 = vector.broadcast %35 : vector<256x1xi32> to vector<256x256xi32>
    %130 = vector.broadcast %126 : vector<1x256xi32> to vector<256x256xi32>
    %131 = arith.cmpi eq, %129, %130 : vector<256x256xi32>
    %cst_39 = arith.constant 0.000000e+00 : f32
    %132 = vector.shape_cast %128 : vector<1x256xf32> to vector<1x256xf32>
    %133 = vector.broadcast %132 : vector<1x256xf32> to vector<256x256xf32>
    %134 = vector.broadcast %cst_39 : f32 to vector<256x256xf32>
    %135 = arith.select %131, %133, %134 : vector<256x256xi1>, vector<256x256xf32>
    %136 = arith.addf %111, %135 : vector<256x256xf32>
    %137 = arith.truncf %136 : vector<256x256xf32> to vector<256x256xbf16>
    %c0_40 = arith.constant 0 : index
    %c0_41 = arith.constant 0 : index
    %138 = vector.load %arg4[%c0_40, %c0_41] : memref<256x256xbf16, #tpu.memory_space<vmem>>, vector<256x256xbf16>
    tpu.vector_store %arg4[%c0_40, %c0_41], %137 {strides = array<i32>} : memref<256x256xbf16, #tpu.memory_space<vmem>>, vector<256x256xbf16>,
    return
  }
  func.func @transform_0(%arg0: i32, %arg1: i32) -> (i32, i32) {
    %c0_i32 = arith.constant 0 : i32
    %c0_i32_0 = arith.constant 0 : i32
    return %c0_i32, %arg1 : i32, i32
  }
  func.func @transform_1(%arg0: i32, %arg1: i32) -> (i32, i32) {
    %c0_i32 = arith.constant 0 : i32
    %c0_i32_0 = arith.constant 0 : i32
    return %c0_i32, %arg1 : i32, i32
  }
  func.func @transform_2(%arg0: i32, %arg1: i32) -> (i32, i32) {
    %c0_i32 = arith.constant 0 : i32
    return %arg0, %arg1 : i32, i32
  }
}

</mosaic_0001>

<bundles_post_ra>
// kernel: tpu_custom_call.1
= control target key start
LH: loop header
LB: loop body
LE: loop exit
PB: predicated region body
PF: predicated region fallthrough
CT: control target
= control target key end

     0   :  { %7 = vsyncpa [#allocation3], 0  ;;  %s2305_s0 = inlined_call_operand.hbm [shape: f32[1,256], index: 0, kind: input, shape index: {}]   ;;  %s2306_s1 = inlined_call_operand.vmem [shape: f32[1,256], index: 1, kind: input, shape index: {}]   ;;  %s2307_s2 = inlined_call_operand.hbm [shape: bf16[256,256], index: 2, kind: output, shape index: {}]  }
   0x1   :  { %8 = vsyncpa [#allocation4], 0  ;;  %s1350_s9 = smov [#allocation2]   ;;  %s1302_s13 = scalar_lea.hbm %s2305_s0, 32 }
   0x2   :  { %s15_s10 = sshll.u32 %s1350_s9, 4  ;;  %p1303_p0 = scmp.ne.s32.totalorder %s2305_s0, %s1302_s13  ;;  %s16_s10 = int_to_ptr.vmem [resolvable:$true] %s15_s10 }
   0x3   :  { %p1306_p1 = scmp.lt.u32.totalorder %s1302_s13, %s2305_s0 }
   0x5   :  { %p1308_p2 = pnand %p1306_p1, %p1303_p0 }
   0x7   :  { %1311 = shalt.err (!%p1308_p2)
}
   0x8   :  { %s1312_s18 = scalar_lea.vmem %s16_s10, 32  ;;  %p1317_p4 = scmp.lt.s32.totalorder %s16_s10, %s16_s10 }
   0x9   :  { %p1313_p3 = scmp.ne.s32.totalorder %s16_s10, %s1312_s18  ;;  %p1318_p5 = scmp.lt.s32.totalorder %s1312_s18, %s1312_s18 }
   0xb   :  { %p1319_p6 = por %p1318_p5, %p1317_p4 }
   0xd   :  { %p1320_p7 = pnand %p1319_p6, %p1313_p3 }
   0xf   :  { %1323 = shalt.err (!%p1320_p7)
}
  0x10   :  { %18 = dma.hbm_to_vmem [thread:$0]  %s2305_s0, 32, %s16_s10, [#allocation3]  }
  0x11   :  { %1346 = dma.done.wait [#allocation3], 32  }
  0x12   :  { %1347 = vsyncadd [#allocation3], 4294967264  ;;  %v45_v0 = vlaneseq  ;;  %v24_v1 = vld [vmem:[#allocation2] sm:$0x3]  ;;  %s1351_s0 = smov [#allocation5]  }
  0x13   :  { %v25_v2 = vld [vmem:[%s2306_s1] sm:$0x3]  ;;  %v26_v3 = vadd.f32 1.0, %v24_v1  ;;  %s1216_s1 = sshll.u32 %s1351_s0, 4  ;;  %s1217_s1 = int_to_ptr.vmem [resolvable:$true] %s1216_s1 }
  0x14   :  { %v30_v4 = vadd.f32 1.0, %v25_v2  ;;  %v1384_v5 = vshrl.u32 %v45_v0, 7  ;;  %s1324_s23 = scalar_lea.vmem %s1217_s1, 4096  ;;  %p1329_p9 = scmp.lt.s32.totalorder %s1217_s1, %s1217_s1 }
  0x15   :  { %v27_v6 = vmul.f32 16.0, %v26_v3  ;;  %p1325_p8 = scmp.ne.s32.totalorder %s1217_s1, %s1324_s23  ;;  %p1330_p10 = scmp.lt.s32.totalorder %s1324_s23, %s1324_s23 }
  0x16   :  { %v31_v7 = vmul.f32 16.0, %v30_v4  ;;  %v1387_v10 = vsub.s32 0, %v1384_v5  ;;  %v1390_v11 = vsub.s32 1, %v1384_v5  ;;  %v1393_v14 = vadd.s32 8, %v1384_v5 }
  0x17   :  { %v1228_v8 = vadd.f32 -1.0, %v27_v6  ;;  %v1396_v15 = vadd.s32 16, %v1384_v5  ;;  %v1399_v16 = vadd.s32 24, %v1384_v5  ;;  %v1402_v17 = vadd.s32 32, %v1384_v5  ;;  %p1331_p11 = por %p1330_p10, %p1329_p9 }
  0x18   :  { %v1229_v9 = vadd.f32 -1.0, %v31_v7  ;;  %v1405_v18 = vadd.s32 40, %v1384_v5  ;;  %v1408_v19 = vadd.s32 48, %v1384_v5  ;;  %v1411_v22 = vadd.s32 56, %v1384_v5 }
  0x19   :  { %v29_v12 = vmul.f32 0.5, %v1228_v8  ;;  %v1414_v23 = vadd.s32 64, %v1384_v5  ;;  %v1417_v24 = vadd.s32 72, %v1384_v5  ;;  %v1420_v25 = vadd.s32 80, %v1384_v5  ;;  %p1332_p12 = pnand %p1331_p11, %p1325_p8 }
  0x1a   :  { %v33_v13 = vmul.f32 0.5, %v1229_v9  ;;  %v1423_v26 = vadd.s32 88, %v1384_v5  ;;  %v1426_v27 = vadd.s32 96, %v1384_v5  ;;  %v1429_v32 = vadd.s32 104, %v1384_v5 }
  0x1b   :  { %v34_v20 = vfloor.f32 %v29_v12  ;;  %v1432_v33 = vadd.s32 112, %v1384_v5  ;;  %v1435_v34 = vadd.s32 120, %v1384_v5  ;;  %v1438_v35 = vadd.s32 128, %v1384_v5 }
  0x1c   :  { %v35_v21 = vfloor.f32 %v33_v13  ;;  %v1441_v40 = vadd.s32 136, %v1384_v5  ;;  %v1444_v41 = vadd.s32 144, %v1384_v5  ;;  %v1447_v42 = vadd.s32 152, %v1384_v5 }
  0x1d   :  { %v1294_v28 = vtrunc.f32 %v34_v20  ;;  %v40_v30 = vsub.f32 %v29_v12, %v34_v20  ;;  %v1450_v43 = vadd.s32 160, %v1384_v5  ;;  %v1457_v50 = vadd.s32 168, %v1384_v5 }
  0x1e   :  { %v1296_v29 = vtrunc.f32 %v35_v21  ;;  %v42_v31 = vsub.f32 %v33_v13, %v35_v21  ;;  %v1464_v56 = vadd.s32 176, %v1384_v5 }
  0x1f   :  { %v1295_v36 = vcvt.f32.s32 %v1294_v28  ;;  %v41_v38 = vsub.f32 1.0, %v40_v30 }
  0x20   :  { %v1297_v37 = vcvt.f32.s32 %v1296_v29  ;;  %v43_v39 = vsub.f32 1.0, %v42_v31  ;;  %v771_v49 = vmul.f32 %v42_v31, %v40_v30 }
  0x21   :  { %v38_v44 = vadd.s32 1, %v1295_v36  ;;  %vm112_vm0 = vcmp.ge.s32.totalorder %v1295_v36, 0  ;;  %vm113_vm1 = vcmp.lt.s32.totalorder %v1295_v36, 16  ;;  %v552_v54 = vmul.f32 %v42_v31, %v41_v38 }
  0x22   :  { %v39_v45 = vadd.s32 1, %v1297_v37  ;;  %v111_v46 = vmul.f32 %v43_v39, %v41_v38  ;;  %vm115_vm2 = vcmp.ge.s32.totalorder %v1297_v37, 0  ;;  %vm117_vm3 = vcmp.lt.s32.totalorder %v1297_v37, 16  ;;  %vm1452_vm4 = vmand %vm112_vm0, %vm113_vm1 }
  0x23   :  { %v119_v47 = vmul.u32 16, %v1297_v37  ;;  %vm334_vm5 = vcmp.ge.s32.totalorder %v38_v44, 0  ;;  %vm335_vm6 = vcmp.lt.s32.totalorder %v38_v44, 16  ;;  %vm116_vm7 = vmand %vm1452_vm4, %vm115_vm2  ;;  %v333_v52 = vmul.f32 %v43_v39, %v40_v30 }
  0x24   :  { %vm118_vm8 = vmand %vm116_vm7, %vm117_vm3  ;;  %vm553_vm9 = vcmp.ge.s32.totalorder %v39_v45, 0  ;;  %vm555_vm10 = vcmp.lt.s32.totalorder %v39_v45, 16  ;;  %v557_v55 = vmul.u32 16, %v39_v45 }
  0x25   :  { %v120_v51 = vadd.s32 %v1295_v36, %v119_v47  ;;  %v339_v53 = vadd.s32 %v119_v47, %v38_v44  ;;  %v121_v57 = vsel %vm118_vm8, %v111_v46, 0.0  ;;  %vm1474_vm11 = vmand %vm334_vm5, %vm335_vm6 }
  0x26   :  { %v1482_v62 = vrot.slane %v121_v57, %v1387_v10  ;;  %v1485_v63 = vrot.slane %v121_v57, %v1390_v11  ;;  %vm337_vm12 = vmand %vm1474_vm11, %vm115_vm2  ;;  %v558_v1 = vadd.s32 %v1295_v36, %v557_v55  ;;  %v774_v2 = vadd.s32 %v557_v55, %v38_v44 }
  0x27   :  { %v1467_v58 = vrot.slane %v120_v51, %v1387_v10  ;;  %v1470_v59 = vrot.slane %v120_v51, %v1390_v11  ;;  %v1479_v61 = vrot.slane %v339_v53, %v1387_v10  ;;  %v1491_v0 = vrot.slane %v339_v53, %v1390_v11  ;;  %vm338_vm15 = vmand %vm337_vm12, %vm117_vm3 }
  0x28   :  { %v340_v6 = vsel %vm338_vm15, %v333_v52, 0.0  ;;  %vm554_vm2 = vmand %vm1452_vm4, %vm553_vm9  ;;  %v1515_v9 = vrot.slane %v558_v1, %v1387_v10  ;;  %v1518_v12 = vrot.slane %v558_v1, %v1390_v11  ;;  %v1524_v20 = vrot.slane %v774_v2, %v1387_v10 }
  0x29   :  { %vm130_vm13 = vcmp.eq.s32.totalorder %v1384_v5, %v1467_v58  ;;  %vm131_vm14 = vcmp.eq.s32.totalorder %v1384_v5, %v1470_v59  ;;  %vm349_vm0 = vcmp.eq.s32.totalorder %v1384_v5, %v1479_v61  ;;  %vm350_vm1 = vcmp.eq.s32.totalorder %v1384_v5, %v1491_v0  ;;  %vm556_vm3 = vmand %vm554_vm2, %vm555_vm10 }
  0x2a   :  { %v205_v3 = vsel %vm130_vm13, %v1482_v62, 0.0  ;;  %v206_v4 = vsel %vm131_vm14, %v1485_v63, 0.0  ;;  %v1508_v7 = vrot.slane %v340_v6, %v1387_v10  ;;  %v1511_v8 = vrot.slane %v340_v6, %v1390_v11  ;;  %vm772_vm5 = vmand %vm1474_vm11, %vm553_vm9 }
  0x2b   :  { %v559_v13 = vsel %vm556_vm3, %v552_v54, 0.0  ;;  %v1527_v21 = vrot.slane %v774_v2, %v1390_v11  ;;  %vm132_vm4 = vcmp.eq.s32.totalorder %v1393_v14, %v1467_v58  ;;  %vm568_vm6 = vcmp.eq.s32.totalorder %v1384_v5, %v1515_v9  ;;  %vm773_vm8 = vmand %vm772_vm5, %vm555_vm10 }
  0x2c   :  { %v424_v28 = vsel %vm349_vm0, %v1508_v7, 0.0  ;;  %v425_v29 = vsel %vm350_vm1, %v1511_v8, 0.0  ;;  %vm569_vm7 = vcmp.eq.s32.totalorder %v1384_v5, %v1518_v12  ;;  %v1542_v36 = vrot.slane %v559_v13, %v1387_v10 }
  0x2d   :  { %v488_v30 = vadd.f32 %v424_v28, %v205_v3  ;;  %v489_v31 = vadd.f32 %v425_v29, %v206_v4  ;;  %v1545_v37 = vrot.slane %v559_v13, %v1390_v11  ;;  %v775_v38 = vsel %vm773_vm8, %v771_v49, 0.0 }
  0x2e   :  { %vm784_vm9 = vcmp.eq.s32.totalorder %v1384_v5, %v1524_v20  ;;  %vm785_vm11 = vcmp.eq.s32.totalorder %v1384_v5, %v1527_v21  ;;  %vm133_vm12 = vcmp.eq.s32.totalorder %v1393_v14, %v1470_v59  ;;  %v643_v39 = vsel %vm568_vm6, %v1542_v36, 0.0 }
  0x2f   :  { %v644_v44 = vsel %vm569_vm7, %v1545_v37, 0.0  ;;  %v1556_v45 = vrot.slane %v775_v38, %v1387_v10  ;;  %v1559_v46 = vrot.slane %v775_v38, %v1390_v11  ;;  %v707_v47 = vadd.f32 %v643_v39, %v488_v30 }
  0x30   :  { %v708_v48 = vadd.f32 %v644_v44, %v489_v31  ;;  %v207_v49 = vsel %vm132_vm4, %v1482_v62, 0.0  ;;  %v208_v51 = vsel %vm133_vm12, %v1485_v63, 0.0  ;;  %vm351_vm10 = vcmp.eq.s32.totalorder %v1393_v14, %v1479_v61 }
  0x31   :  { %v859_v52 = vsel %vm784_vm9, %v1556_v45, 0.0  ;;  %v860_v53 = vsel %vm785_vm11, %v1559_v46, 0.0  ;;  %vm352_vm13 = vcmp.eq.s32.totalorder %v1393_v14, %v1491_v0  ;;  %v426_v54 = vsel %vm351_vm10, %v1508_v7, 0.0 }
  0x32   :  { %v923_v10 = vadd.f32 %v859_v52, %v707_v47  ;;  %v924_v11 = vadd.f32 %v860_v53, %v708_v48  ;;  %v427_v55 = vsel %vm352_vm13, %v1511_v8, 0.0  ;;  %v490_v57 = vadd.f32 %v426_v54, %v207_v49 }
  0x33   :  { %v491_v60 = vadd.f32 %v427_v55, %v208_v51  ;;  %vm570_vm14 = vcmp.eq.s32.totalorder %v1393_v14, %v1515_v9  ;;  %vm571_vm15 = vcmp.eq.s32.totalorder %v1393_v14, %v1518_v12  ;;  %vm786_vm0 = vcmp.eq.s32.totalorder %v1393_v14, %v1524_v20 }
  0x34   :  { %v1262_v1 = vpack.c.bf16 %v924_v11, %v923_v10  ;;  %v645_v2 = vsel %vm570_vm14, %v1542_v36, 0.0  ;;  %v646_v3 = vsel %vm571_vm15, %v1545_v37, 0.0  ;;  %vm787_vm1 = vcmp.eq.s32.totalorder %v1393_v14, %v1527_v21 }
  0x35   :  { %v709_v4 = vadd.f32 %v645_v2, %v490_v57  ;;  %v710_v6 = vadd.f32 %v646_v3, %v491_v60  ;;  %v861_v13 = vsel %vm786_vm0, %v1556_v45, 0.0  ;;  %v862_v28 = vsel %vm787_vm1, %v1559_v46, 0.0 }
  0x36   :  { %1179 = vst [vmem:[#allocation5] sm:$0xff] %v1262_v1  ;;  %vm134_vm2 = vcmp.eq.s32.totalorder %v1396_v15, %v1467_v58  ;;  %vm135_vm3 = vcmp.eq.s32.totalorder %v1396_v15, %v1470_v59  ;;  %vm353_vm5 = vcmp.eq.s32.totalorder %v1396_v15, %v1479_v61  ;;  %vm354_vm4 = vcmp.eq.s32.totalorder %v1396_v15, %v1491_v0 }
  0x37   :  { %v925_v29 = vadd.f32 %v861_v13, %v709_v4  ;;  %v926_v30 = vadd.f32 %v862_v28, %v710_v6  ;;  %v209_v31 = vsel %vm134_vm2, %v1482_v62, 0.0  ;;  %v210_v14 = vsel %vm135_vm3, %v1485_v63, 0.0 }
  0x38   :  { %v428_v38 = vsel %vm353_vm5, %v1508_v7, 0.0  ;;  %vm572_vm6 = vcmp.eq.s32.totalorder %v1396_v15, %v1515_v9  ;;  %vm573_vm7 = vcmp.eq.s32.totalorder %v1396_v15, %v1518_v12  ;;  %v429_v44 = vsel %vm354_vm4, %v1511_v8, 0.0 }
  0x39   :  { %v1263_v39 = vpack.c.bf16 %v926_v30, %v925_v29  ;;  %v492_v47 = vadd.f32 %v428_v38, %v209_v31  ;;  %v647_v48 = vsel %vm572_vm6, %v1542_v36, 0.0  ;;  %v493_v49 = vadd.f32 %v429_v44, %v210_v14 }
  0x3a   :  { %v648_v51 = vsel %vm573_vm7, %v1545_v37, 0.0  ;;  %vm788_vm8 = vcmp.eq.s32.totalorder %v1396_v15, %v1524_v20  ;;  %vm789_vm9 = vcmp.eq.s32.totalorder %v1396_v15, %v1527_v21  ;;  %vm136_vm11 = vcmp.eq.s32.totalorder %v1399_v16, %v1467_v58 }
  0x3b   :  { %1180 = vst [vmem:[#allocation5 + $0x8] sm:$0xff] %v1263_v39  ;;  %v711_v52 = vadd.f32 %v647_v48, %v492_v47  ;;  %v863_v53 = vsel %vm788_vm8, %v1556_v45, 0.0  ;;  %v864_v10 = vsel %vm789_vm9, %v1559_v46, 0.0  ;;  %v712_v11 = vadd.f32 %v648_v51, %v493_v49 }
  0x3c   :  { %vm137_vm12 = vcmp.eq.s32.totalorder %v1399_v16, %v1470_v59  ;;  %v211_v54 = vsel %vm136_vm11, %v1482_v62, 0.0  ;;  %vm355_vm10 = vcmp.eq.s32.totalorder %v1399_v16, %v1479_v61  ;;  %vm356_vm13 = vcmp.eq.s32.totalorder %v1399_v16, %v1491_v0 }
  0x3d   :  { %v927_v55 = vadd.f32 %v863_v53, %v711_v52  ;;  %v212_v15 = vsel %vm137_vm12, %v1485_v63, 0.0  ;;  %v430_v57 = vsel %vm355_vm10, %v1508_v7, 0.0  ;;  %v928_v60 = vadd.f32 %v864_v10, %v712_v11 }
  0x3e   :  { %v431_v1 = vsel %vm356_vm13, %v1511_v8, 0.0  ;;  %v494_v2 = vadd.f32 %v430_v57, %v211_v54  ;;  %vm574_vm14 = vcmp.eq.s32.totalorder %v1399_v16, %v1515_v9  ;;  %vm575_vm15 = vcmp.eq.s32.totalorder %v1399_v16, %v1518_v12 }
  0x3f   :  { %v495_v3 = vadd.f32 %v431_v1, %v212_v15  ;;  %v649_v4 = vsel %vm574_vm14, %v1542_v36, 0.0  ;;  %vm790_vm0 = vcmp.eq.s32.totalorder %v1399_v16, %v1524_v20  ;;  %v1264_v6 = vpack.c.bf16 %v928_v60, %v927_v55 }
  0x40   :  { %v650_v13 = vsel %vm575_vm15, %v1545_v37, 0.0  ;;  %v713_v28 = vadd.f32 %v649_v4, %v494_v2  ;;  %vm791_vm1 = vcmp.eq.s32.totalorder %v1399_v16, %v1527_v21  ;;  %v865_v30 = vsel %vm790_vm0, %v1556_v45, 0.0 }
  0x41   :  { %v714_v29 = vadd.f32 %v650_v13, %v495_v3  ;;  %v866_v31 = vsel %vm791_vm1, %v1559_v46, 0.0  ;;  %vm138_vm2 = vcmp.eq.s32.totalorder %v1402_v17, %v1467_v58  ;;  %1181 = vst [vmem:[#allocation5 + $0x10] sm:$0xff] %v1264_v6  ;;  %vm139_vm3 = vcmp.eq.s32.totalorder %v1402_v17, %v1470_v59 }
  0x42   :  { %v929_v14 = vadd.f32 %v865_v30, %v713_v28  ;;  %v213_v38 = vsel %vm138_vm2, %v1482_v62, 0.0  ;;  %vm357_vm5 = vcmp.eq.s32.totalorder %v1402_v17, %v1479_v61  ;;  %v214_v16 = vsel %vm139_vm3, %v1485_v63, 0.0 }
  0x43   :  { %v930_v39 = vadd.f32 %v866_v31, %v714_v29  ;;  %vm358_vm4 = vcmp.eq.s32.totalorder %v1402_v17, %v1491_v0  ;;  %v432_v44 = vsel %vm357_vm5, %v1508_v7, 0.0  ;;  %vm576_vm6 = vcmp.eq.s32.totalorder %v1402_v17, %v1515_v9 }
  0x44   :  { %v433_v47 = vsel %vm358_vm4, %v1511_v8, 0.0  ;;  %v496_v48 = vadd.f32 %v432_v44, %v213_v38  ;;  %vm577_vm7 = vcmp.eq.s32.totalorder %v1402_v17, %v1518_v12  ;;  %v651_v52 = vsel %vm576_vm6, %v1542_v36, 0.0 }
  0x45   :  { %v1265_v49 = vpack.c.bf16 %v930_v39, %v929_v14  ;;  %v497_v51 = vadd.f32 %v433_v47, %v214_v16  ;;  %v652_v53 = vsel %vm577_vm7, %v1545_v37, 0.0  ;;  %vm792_vm8 = vcmp.eq.s32.totalorder %v1402_v17, %v1524_v20 }
  0x46   :  { %v715_v10 = vadd.f32 %v651_v52, %v496_v48  ;;  %vm793_vm9 = vcmp.eq.s32.totalorder %v1402_v17, %v1527_v21  ;;  %vm140_vm11 = vcmp.eq.s32.totalorder %v1405_v18, %v1467_v58  ;;  %v867_v54 = vsel %vm792_vm8, %v1556_v45, 0.0 }
  0x47   :  { %1182 = vst [vmem:[#allocation5 + $0x18] sm:$0xff] %v1265_v49  ;;  %v716_v11 = vadd.f32 %v652_v53, %v497_v51  ;;  %v868_v55 = vsel %vm793_vm9, %v1559_v46, 0.0  ;;  %vm141_vm12 = vcmp.eq.s32.totalorder %v1405_v18, %v1470_v59  ;;  %v215_v57 = vsel %vm140_vm11, %v1482_v62, 0.0 }
  0x48   :  { %v931_v15 = vadd.f32 %v867_v54, %v715_v10  ;;  %v216_v60 = vsel %vm141_vm12, %v1485_v63, 0.0  ;;  %vm359_vm10 = vcmp.eq.s32.totalorder %v1405_v18, %v1479_v61  ;;  %vm360_vm13 = vcmp.eq.s32.totalorder %v1405_v18, %v1491_v0 }
  0x49   :  { %v932_v17 = vadd.f32 %v868_v55, %v716_v11  ;;  %v434_v1 = vsel %vm359_vm10, %v1508_v7, 0.0  ;;  %vm578_vm14 = vcmp.eq.s32.totalorder %v1405_v18, %v1515_v9  ;;  %v435_v2 = vsel %vm360_vm13, %v1511_v8, 0.0 }
  0x4a   :  { %v498_v3 = vadd.f32 %v434_v1, %v215_v57  ;;  %vm579_vm15 = vcmp.eq.s32.totalorder %v1405_v18, %v1518_v12  ;;  %v653_v4 = vsel %vm578_vm14, %v1542_v36, 0.0  ;;  %v499_v13 = vadd.f32 %v435_v2, %v216_v60 }
  0x4b   :  { %v1266_v6 = vpack.c.bf16 %v932_v17, %v931_v15  ;;  %v654_v28 = vsel %vm579_vm15, %v1545_v37, 0.0  ;;  %vm794_vm0 = vcmp.eq.s32.totalorder %v1405_v18, %v1524_v20  ;;  %vm795_vm1 = vcmp.eq.s32.totalorder %v1405_v18, %v1527_v21 }
  0x4c   :  { %v717_v29 = vadd.f32 %v653_v4, %v498_v3  ;;  %v869_v30 = vsel %vm794_vm0, %v1556_v45, 0.0  ;;  %vm142_vm2 = vcmp.eq.s32.totalorder %v1408_v19, %v1467_v58  ;;  %v718_v31 = vadd.f32 %v654_v28, %v499_v13 }
  0x4d   :  { %1183 = vst [vmem:[#allocation5 + $0x20] sm:$0xff] %v1266_v6  ;;  %v870_v14 = vsel %vm795_vm1, %v1559_v46, 0.0  ;;  %vm143_vm3 = vcmp.eq.s32.totalorder %v1408_v19, %v1470_v59  ;;  %v217_v38 = vsel %vm142_vm2, %v1482_v62, 0.0  ;;  %vm361_vm5 = vcmp.eq.s32.totalorder %v1408_v19, %v1479_v61 }
  0x4e   :  { %v933_v39 = vadd.f32 %v869_v30, %v717_v29  ;;  %v218_v16 = vsel %vm143_vm3, %v1485_v63, 0.0  ;;  %vm362_vm4 = vcmp.eq.s32.totalorder %v1408_v19, %v1491_v0  ;;  %v934_v18 = vadd.f32 %v870_v14, %v718_v31 }
  0x4f   :  { %v436_v44 = vsel %vm361_vm5, %v1508_v7, 0.0  ;;  %v437_v47 = vsel %vm362_vm4, %v1511_v8, 0.0  ;;  %vm580_vm6 = vcmp.eq.s32.totalorder %v1408_v19, %v1515_v9  ;;  %vm581_vm7 = vcmp.eq.s32.totalorder %v1408_v19, %v1518_v12 }
  0x50   :  { %v500_v48 = vadd.f32 %v436_v44, %v217_v38  ;;  %v501_v49 = vadd.f32 %v437_v47, %v218_v16  ;;  %v655_v51 = vsel %vm580_vm6, %v1542_v36, 0.0  ;;  %v1267_v52 = vpack.c.bf16 %v934_v18, %v933_v39 }
  0x51   :  { %v656_v53 = vsel %vm581_vm7, %v1545_v37, 0.0  ;;  %vm796_vm8 = vcmp.eq.s32.totalorder %v1408_v19, %v1524_v20  ;;  %vm797_vm9 = vcmp.eq.s32.totalorder %v1408_v19, %v1527_v21  ;;  %vm144_vm11 = vcmp.eq.s32.totalorder %v1411_v22, %v1467_v58 }
  0x52   :  { %v719_v10 = vadd.f32 %v655_v51, %v500_v48  ;;  %v720_v11 = vadd.f32 %v656_v53, %v501_v49  ;;  %v871_v54 = vsel %vm796_vm8, %v1556_v45, 0.0  ;;  %v872_v55 = vsel %vm797_vm9, %v1559_v46, 0.0  ;;  %1184 = vst [vmem:[#allocation5 + $0x28] sm:$0xff] %v1267_v52 }
  0x53   :  { %vm145_vm12 = vcmp.eq.s32.totalorder %v1411_v22, %v1470_v59  ;;  %vm363_vm10 = vcmp.eq.s32.totalorder %v1411_v22, %v1479_v61  ;;  %vm364_vm13 = vcmp.eq.s32.totalorder %v1411_v22, %v1491_v0  ;;  %v219_v57 = vsel %vm144_vm11, %v1482_v62, 0.0 }
  0x54   :  { %v935_v19 = vadd.f32 %v871_v54, %v719_v10  ;;  %v936_v15 = vadd.f32 %v872_v55, %v720_v11  ;;  %v220_v60 = vsel %vm145_vm12, %v1485_v63, 0.0  ;;  %v438_v17 = vsel %vm363_vm10, %v1508_v7, 0.0 }
  0x55   :  { %v439_v1 = vsel %vm364_vm13, %v1511_v8, 0.0  ;;  %vm582_vm14 = vcmp.eq.s32.totalorder %v1411_v22, %v1515_v9  ;;  %vm583_vm15 = vcmp.eq.s32.totalorder %v1411_v22, %v1518_v12  ;;  %v502_v3 = vadd.f32 %v438_v17, %v219_v57 }
  0x56   :  { %v1268_v2 = vpack.c.bf16 %v936_v15, %v935_v19  ;;  %v503_v4 = vadd.f32 %v439_v1, %v220_v60  ;;  %v657_v6 = vsel %vm582_vm14, %v1542_v36, 0.0  ;;  %v658_v13 = vsel %vm583_vm15, %v1545_v37, 0.0 }
  0x57   :  { %vm798_vm0 = vcmp.eq.s32.totalorder %v1411_v22, %v1524_v20  ;;  %vm799_vm1 = vcmp.eq.s32.totalorder %v1411_v22, %v1527_v21  ;;  %vm146_vm2 = vcmp.eq.s32.totalorder %v1414_v23, %v1467_v58  ;;  %v721_v28 = vadd.f32 %v657_v6, %v502_v3 }
  0x58   :  { %1185 = vst [vmem:[#allocation5 + $0x30] sm:$0xff] %v1268_v2  ;;  %v722_v29 = vadd.f32 %v658_v13, %v503_v4  ;;  %v873_v30 = vsel %vm798_vm0, %v1556_v45, 0.0  ;;  %v874_v31 = vsel %vm799_vm1, %v1559_v46, 0.0  ;;  %vm147_vm3 = vcmp.eq.s32.totalorder %v1414_v23, %v1470_v59 }
  0x59   :  { %v221_v14 = vsel %vm146_vm2, %v1482_v62, 0.0  ;;  %vm365_vm5 = vcmp.eq.s32.totalorder %v1414_v23, %v1479_v61  ;;  %vm366_vm4 = vcmp.eq.s32.totalorder %v1414_v23, %v1491_v0  ;;  %v937_v22 = vadd.f32 %v873_v30, %v721_v28 }
  0x5a   :  { %v938_v38 = vadd.f32 %v874_v31, %v722_v29  ;;  %v222_v39 = vsel %vm147_vm3, %v1485_v63, 0.0  ;;  %v440_v16 = vsel %vm365_vm5, %v1508_v7, 0.0  ;;  %v441_v18 = vsel %vm366_vm4, %v1511_v8, 0.0 }
  0x5b   :  { %v504_v44 = vadd.f32 %v440_v16, %v221_v14  ;;  %vm584_vm6 = vcmp.eq.s32.totalorder %v1414_v23, %v1515_v9  ;;  %vm585_vm7 = vcmp.eq.s32.totalorder %v1414_v23, %v1518_v12  ;;  %v505_v48 = vadd.f32 %v441_v18, %v222_v39 }
  0x5c   :  { %v1269_v47 = vpack.c.bf16 %v938_v38, %v937_v22  ;;  %v659_v49 = vsel %vm584_vm6, %v1542_v36, 0.0  ;;  %v660_v51 = vsel %vm585_vm7, %v1545_v37, 0.0  ;;  %vm800_vm8 = vcmp.eq.s32.totalorder %v1414_v23, %v1524_v20 }
  0x5d   :  { %v723_v52 = vadd.f32 %v659_v49, %v504_v44  ;;  %vm801_vm9 = vcmp.eq.s32.totalorder %v1414_v23, %v1527_v21  ;;  %vm148_vm11 = vcmp.eq.s32.totalorder %v1417_v24, %v1467_v58  ;;  %v724_v53 = vadd.f32 %v660_v51, %v505_v48 }
  0x5e   :  { %1186 = vst [vmem:[#allocation5 + $0x38] sm:$0xff] %v1269_v47  ;;  %v875_v10 = vsel %vm800_vm8, %v1556_v45, 0.0  ;;  %v876_v11 = vsel %vm801_vm9, %v1559_v46, 0.0  ;;  %vm149_vm12 = vcmp.eq.s32.totalorder %v1417_v24, %v1470_v59  ;;  %v223_v55 = vsel %vm148_vm11, %v1482_v62, 0.0 }
  0x5f   :  { %v939_v54 = vadd.f32 %v875_v10, %v723_v52  ;;  %v224_v19 = vsel %vm149_vm12, %v1485_v63, 0.0  ;;  %vm367_vm10 = vcmp.eq.s32.totalorder %v1417_v24, %v1479_v61  ;;  %v940_v23 = vadd.f32 %v876_v11, %v724_v53 }
  0x60   :  { %vm368_vm13 = vcmp.eq.s32.totalorder %v1417_v24, %v1491_v0  ;;  %v442_v15 = vsel %vm367_vm10, %v1508_v7, 0.0  ;;  %vm586_vm14 = vcmp.eq.s32.totalorder %v1417_v24, %v1515_v9  ;;  %vm587_vm15 = vcmp.eq.s32.totalorder %v1417_v24, %v1518_v12 }
  0x61   :  { %v443_v57 = vsel %vm368_vm13, %v1511_v8, 0.0  ;;  %v506_v60 = vadd.f32 %v442_v15, %v223_v55  ;;  %v661_v17 = vsel %vm586_vm14, %v1542_v36, 0.0  ;;  %v1270_v1 = vpack.c.bf16 %v940_v23, %v939_v54 }
  0x62   :  { %v507_v2 = vadd.f32 %v443_v57, %v224_v19  ;;  %v662_v3 = vsel %vm587_vm15, %v1545_v37, 0.0  ;;  %vm802_vm0 = vcmp.eq.s32.totalorder %v1417_v24, %v1524_v20  ;;  %vm803_vm1 = vcmp.eq.s32.totalorder %v1417_v24, %v1527_v21 }
  0x63   :  { %v725_v4 = vadd.f32 %v661_v17, %v506_v60  ;;  %v877_v6 = vsel %vm802_vm0, %v1556_v45, 0.0  ;;  %vm150_vm2 = vcmp.eq.s32.totalorder %v1420_v25, %v1467_v58  ;;  %1187 = vst [vmem:[#allocation5 + $0x40] sm:$0xff] %v1270_v1  ;;  %v878_v28 = vsel %vm803_vm1, %v1559_v46, 0.0 }
  0x64   :  { %v726_v13 = vadd.f32 %v662_v3, %v507_v2  ;;  %vm151_vm3 = vcmp.eq.s32.totalorder %v1420_v25, %v1470_v59  ;;  %v225_v29 = vsel %vm150_vm2, %v1482_v62, 0.0  ;;  %vm369_vm5 = vcmp.eq.s32.totalorder %v1420_v25, %v1479_v61 }
  0x65   :  { %v941_v30 = vadd.f32 %v877_v6, %v725_v4  ;;  %v226_v31 = vsel %vm151_vm3, %v1485_v63, 0.0  ;;  %vm370_vm4 = vcmp.eq.s32.totalorder %v1420_v25, %v1491_v0  ;;  %v444_v14 = vsel %vm369_vm5, %v1508_v7, 0.0 }
  0x66   :  { %v942_v24 = vadd.f32 %v878_v28, %v726_v13  ;;  %v445_v22 = vsel %vm370_vm4, %v1511_v8, 0.0  ;;  %vm588_vm6 = vcmp.eq.s32.totalorder %v1420_v25, %v1515_v9  ;;  %v508_v38 = vadd.f32 %v444_v14, %v225_v29 }
  0x67   :  { %v509_v39 = vadd.f32 %v445_v22, %v226_v31  ;;  %vm589_vm7 = vcmp.eq.s32.totalorder %v1420_v25, %v1518_v12  ;;  %v663_v16 = vsel %vm588_vm6, %v1542_v36, 0.0  ;;  %vm804_vm8 = vcmp.eq.s32.totalorder %v1420_v25, %v1524_v20 }
  0x68   :  { %v1271_v18 = vpack.c.bf16 %v942_v24, %v941_v30  ;;  %v664_v44 = vsel %vm589_vm7, %v1545_v37, 0.0  ;;  %vm805_vm9 = vcmp.eq.s32.totalorder %v1420_v25, %v1527_v21  ;;  %v727_v47 = vadd.f32 %v663_v16, %v508_v38 }
  0x69   :  { %v728_v48 = vadd.f32 %v664_v44, %v509_v39  ;;  %v879_v49 = vsel %vm804_vm8, %v1556_v45, 0.0  ;;  %v880_v51 = vsel %vm805_vm9, %v1559_v46, 0.0  ;;  %vm152_vm11 = vcmp.eq.s32.totalorder %v1423_v26, %v1467_v58 }
  0x6a   :  { %1188 = vst [vmem:[#allocation5 + $0x48] sm:$0xff] %v1271_v18  ;;  %vm153_vm12 = vcmp.eq.s32.totalorder %v1423_v26, %v1470_v59  ;;  %vm371_vm10 = vcmp.eq.s32.totalorder %v1423_v26, %v1479_v61  ;;  %vm372_vm13 = vcmp.eq.s32.totalorder %v1423_v26, %v1491_v0  ;;  %v943_v25 = vadd.f32 %v879_v49, %v727_v47 }
  0x6b   :  { %v944_v52 = vadd.f32 %v880_v51, %v728_v48  ;;  %v227_v53 = vsel %vm152_vm11, %v1482_v62, 0.0  ;;  %v228_v10 = vsel %vm153_vm12, %v1485_v63, 0.0  ;;  %v446_v11 = vsel %vm371_vm10, %v1508_v7, 0.0 }
  0x6c   :  { %v447_v54 = vsel %vm372_vm13, %v1511_v8, 0.0  ;;  %vm590_vm14 = vcmp.eq.s32.totalorder %v1423_v26, %v1515_v9  ;;  %vm591_vm15 = vcmp.eq.s32.totalorder %v1423_v26, %v1518_v12  ;;  %v510_v19 = vadd.f32 %v446_v11, %v227_v53 }
  0x6d   :  { %v1272_v55 = vpack.c.bf16 %v944_v52, %v943_v25  ;;  %v511_v23 = vadd.f32 %v447_v54, %v228_v10  ;;  %v665_v15 = vsel %vm590_vm14, %v1542_v36, 0.0  ;;  %v666_v57 = vsel %vm591_vm15, %v1545_v37, 0.0 }
  0x6e   :  { %vm806_vm0 = vcmp.eq.s32.totalorder %v1423_v26, %v1524_v20  ;;  %vm807_vm1 = vcmp.eq.s32.totalorder %v1423_v26, %v1527_v21  ;;  %vm154_vm2 = vcmp.eq.s32.totalorder %v1426_v27, %v1467_v58  ;;  %v729_v60 = vadd.f32 %v665_v15, %v510_v19 }
  0x6f   :  { %1189 = vst [vmem:[#allocation5 + $0x50] sm:$0xff] %v1272_v55  ;;  %v730_v17 = vadd.f32 %v666_v57, %v511_v23  ;;  %v881_v1 = vsel %vm806_vm0, %v1556_v45, 0.0  ;;  %v882_v2 = vsel %vm807_vm1, %v1559_v46, 0.0  ;;  %vm155_vm3 = vcmp.eq.s32.totalorder %v1426_v27, %v1470_v59 }
  0x70   :  { %v229_v3 = vsel %vm154_vm2, %v1482_v62, 0.0  ;;  %vm373_vm5 = vcmp.eq.s32.totalorder %v1426_v27, %v1479_v61  ;;  %vm374_vm4 = vcmp.eq.s32.totalorder %v1426_v27, %v1491_v0  ;;  %v945_v26 = vadd.f32 %v881_v1, %v729_v60 }
  0x71   :  { %v946_v4 = vadd.f32 %v882_v2, %v730_v17  ;;  %v230_v6 = vsel %vm155_vm3, %v1485_v63, 0.0  ;;  %v448_v13 = vsel %vm373_vm5, %v1508_v7, 0.0  ;;  %v449_v28 = vsel %vm374_vm4, %v1511_v8, 0.0 }
  0x72   :  { %v512_v29 = vadd.f32 %v448_v13, %v229_v3  ;;  %vm592_vm6 = vcmp.eq.s32.totalorder %v1426_v27, %v1515_v9  ;;  %vm593_vm7 = vcmp.eq.s32.totalorder %v1426_v27, %v1518_v12  ;;  %v513_v31 = vadd.f32 %v449_v28, %v230_v6 }
  0x73   :  { %v1273_v30 = vpack.c.bf16 %v946_v4, %v945_v26  ;;  %v667_v24 = vsel %vm592_vm6, %v1542_v36, 0.0  ;;  %v668_v14 = vsel %vm593_vm7, %v1545_v37, 0.0  ;;  %vm808_vm8 = vcmp.eq.s32.totalorder %v1426_v27, %v1524_v20 }
  0x74   :  { %v731_v22 = vadd.f32 %v667_v24, %v512_v29  ;;  %vm809_vm9 = vcmp.eq.s32.totalorder %v1426_v27, %v1527_v21  ;;  %vm156_vm11 = vcmp.eq.s32.totalorder %v1429_v32, %v1467_v58  ;;  %v732_v38 = vadd.f32 %v668_v14, %v513_v31 }
  0x75   :  { %1190 = vst [vmem:[#allocation5 + $0x58] sm:$0xff] %v1273_v30  ;;  %v883_v39 = vsel %vm808_vm8, %v1556_v45, 0.0  ;;  %v884_v16 = vsel %vm809_vm9, %v1559_v46, 0.0  ;;  %vm157_vm12 = vcmp.eq.s32.totalorder %v1429_v32, %v1470_v59  ;;  %v231_v44 = vsel %vm156_vm11, %v1482_v62, 0.0 }
  0x76   :  { %v947_v18 = vadd.f32 %v883_v39, %v731_v22  ;;  %v232_v47 = vsel %vm157_vm12, %v1485_v63, 0.0  ;;  %vm375_vm10 = vcmp.eq.s32.totalorder %v1429_v32, %v1479_v61  ;;  %v948_v27 = vadd.f32 %v884_v16, %v732_v38 }
  0x77   :  { %vm376_vm13 = vcmp.eq.s32.totalorder %v1429_v32, %v1491_v0  ;;  %v450_v48 = vsel %vm375_vm10, %v1508_v7, 0.0  ;;  %vm594_vm14 = vcmp.eq.s32.totalorder %v1429_v32, %v1515_v9  ;;  %vm595_vm15 = vcmp.eq.s32.totalorder %v1429_v32, %v1518_v12 }
  0x78   :  { %v451_v49 = vsel %vm376_vm13, %v1511_v8, 0.0  ;;  %v514_v51 = vadd.f32 %v450_v48, %v231_v44  ;;  %v669_v25 = vsel %vm594_vm14, %v1542_v36, 0.0  ;;  %v1274_v52 = vpack.c.bf16 %v948_v27, %v947_v18 }
  0x79   :  { %v515_v53 = vadd.f32 %v451_v49, %v232_v47  ;;  %v670_v10 = vsel %vm595_vm15, %v1545_v37, 0.0  ;;  %vm810_vm0 = vcmp.eq.s32.totalorder %v1429_v32, %v1524_v20  ;;  %vm811_vm1 = vcmp.eq.s32.totalorder %v1429_v32, %v1527_v21 }
  0x7a   :  { %v733_v11 = vadd.f32 %v669_v25, %v514_v51  ;;  %v885_v54 = vsel %vm810_vm0, %v1556_v45, 0.0  ;;  %vm158_vm2 = vcmp.eq.s32.totalorder %v1432_v33, %v1467_v58  ;;  %1191 = vst [vmem:[#allocation5 + $0x60] sm:$0xff] %v1274_v52  ;;  %v886_v19 = vsel %vm811_vm1, %v1559_v46, 0.0 }
  0x7b   :  { %v734_v55 = vadd.f32 %v670_v10, %v515_v53  ;;  %vm159_vm3 = vcmp.eq.s32.totalorder %v1432_v33, %v1470_v59  ;;  %v233_v23 = vsel %vm158_vm2, %v1482_v62, 0.0  ;;  %vm377_vm5 = vcmp.eq.s32.totalorder %v1432_v33, %v1479_v61 }
  0x7c   :  { %v949_v15 = vadd.f32 %v885_v54, %v733_v11  ;;  %v234_v57 = vsel %vm159_vm3, %v1485_v63, 0.0  ;;  %vm378_vm4 = vcmp.eq.s32.totalorder %v1432_v33, %v1491_v0  ;;  %v452_v60 = vsel %vm377_vm5, %v1508_v7, 0.0 }
  0x7d   :  { %v950_v32 = vadd.f32 %v886_v19, %v734_v55  ;;  %v453_v17 = vsel %vm378_vm4, %v1511_v8, 0.0  ;;  %vm596_vm6 = vcmp.eq.s32.totalorder %v1432_v33, %v1515_v9  ;;  %v516_v1 = vadd.f32 %v452_v60, %v233_v23 }
  0x7e   :  { %v517_v2 = vadd.f32 %v453_v17, %v234_v57  ;;  %vm597_vm7 = vcmp.eq.s32.totalorder %v1432_v33, %v1518_v12  ;;  %v671_v3 = vsel %vm596_vm6, %v1542_v36, 0.0  ;;  %vm812_vm8 = vcmp.eq.s32.totalorder %v1432_v33, %v1524_v20 }
  0x7f   :  { %v1275_v26 = vpack.c.bf16 %v950_v32, %v949_v15  ;;  %v672_v4 = vsel %vm597_vm7, %v1545_v37, 0.0  ;;  %vm813_vm9 = vcmp.eq.s32.totalorder %v1432_v33, %v1527_v21  ;;  %v735_v6 = vadd.f32 %v671_v3, %v516_v1 }
  0x80   :  { %v736_v13 = vadd.f32 %v672_v4, %v517_v2  ;;  %v887_v28 = vsel %vm812_vm8, %v1556_v45, 0.0  ;;  %v888_v29 = vsel %vm813_vm9, %v1559_v46, 0.0  ;;  %vm160_vm11 = vcmp.eq.s32.totalorder %v1435_v34, %v1467_v58 }
  0x81   :  { %1192 = vst [vmem:[#allocation5 + $0x68] sm:$0xff] %v1275_v26  ;;  %vm161_vm12 = vcmp.eq.s32.totalorder %v1435_v34, %v1470_v59  ;;  %vm379_vm10 = vcmp.eq.s32.totalorder %v1435_v34, %v1479_v61  ;;  %vm380_vm13 = vcmp.eq.s32.totalorder %v1435_v34, %v1491_v0  ;;  %v951_v33 = vadd.f32 %v887_v28, %v735_v6 }
  0x82   :  { %v952_v30 = vadd.f32 %v888_v29, %v736_v13  ;;  %v235_v31 = vsel %vm160_vm11, %v1482_v62, 0.0  ;;  %v236_v24 = vsel %vm161_vm12, %v1485_v63, 0.0  ;;  %v454_v14 = vsel %vm379_vm10, %v1508_v7, 0.0 }
  0x83   :  { %v455_v22 = vsel %vm380_vm13, %v1511_v8, 0.0  ;;  %vm598_vm14 = vcmp.eq.s32.totalorder %v1435_v34, %v1515_v9  ;;  %vm599_vm15 = vcmp.eq.s32.totalorder %v1435_v34, %v1518_v12  ;;  %v518_v39 = vadd.f32 %v454_v14, %v235_v31 }
  0x84   :  { %v1276_v38 = vpack.c.bf16 %v952_v30, %v951_v33  ;;  %v519_v16 = vadd.f32 %v455_v22, %v236_v24  ;;  %v673_v18 = vsel %vm598_vm14, %v1542_v36, 0.0  ;;  %v674_v44 = vsel %vm599_vm15, %v1545_v37, 0.0 }
  0x85   :  { %vm814_vm0 = vcmp.eq.s32.totalorder %v1435_v34, %v1524_v20  ;;  %vm815_vm1 = vcmp.eq.s32.totalorder %v1435_v34, %v1527_v21  ;;  %vm162_vm2 = vcmp.eq.s32.totalorder %v1438_v35, %v1467_v58  ;;  %v737_v47 = vadd.f32 %v673_v18, %v518_v39 }
  0x86   :  { %1193 = vst [vmem:[#allocation5 + $0x70] sm:$0xff] %v1276_v38  ;;  %v738_v27 = vadd.f32 %v674_v44, %v519_v16  ;;  %v889_v48 = vsel %vm814_vm0, %v1556_v45, 0.0  ;;  %v890_v49 = vsel %vm815_vm1, %v1559_v46, 0.0  ;;  %vm163_vm3 = vcmp.eq.s32.totalorder %v1438_v35, %v1470_v59 }
  0x87   :  { %v237_v51 = vsel %vm162_vm2, %v1482_v62, 0.0  ;;  %vm381_vm5 = vcmp.eq.s32.totalorder %v1438_v35, %v1479_v61  ;;  %vm382_vm4 = vcmp.eq.s32.totalorder %v1438_v35, %v1491_v0  ;;  %v953_v34 = vadd.f32 %v889_v48, %v737_v47 }
  0x88   :  { %v954_v25 = vadd.f32 %v890_v49, %v738_v27  ;;  %v238_v52 = vsel %vm163_vm3, %v1485_v63, 0.0  ;;  %v456_v53 = vsel %vm381_vm5, %v1508_v7, 0.0  ;;  %v457_v10 = vsel %vm382_vm4, %v1511_v8, 0.0 }
  0x89   :  { %v520_v11 = vadd.f32 %v456_v53, %v237_v51  ;;  %vm600_vm6 = vcmp.eq.s32.totalorder %v1438_v35, %v1515_v9  ;;  %vm601_vm7 = vcmp.eq.s32.totalorder %v1438_v35, %v1518_v12  ;;  %v521_v55 = vadd.f32 %v457_v10, %v238_v52 }
  0x8a   :  { %v1277_v54 = vpack.c.bf16 %v954_v25, %v953_v34  ;;  %v675_v19 = vsel %vm600_vm6, %v1542_v36, 0.0  ;;  %v676_v23 = vsel %vm601_vm7, %v1545_v37, 0.0  ;;  %vm816_vm8 = vcmp.eq.s32.totalorder %v1438_v35, %v1524_v20 }
  0x8b   :  { %v739_v15 = vadd.f32 %v675_v19, %v520_v11  ;;  %vm817_vm9 = vcmp.eq.s32.totalorder %v1438_v35, %v1527_v21  ;;  %vm164_vm11 = vcmp.eq.s32.totalorder %v1441_v40, %v1467_v58  ;;  %v740_v57 = vadd.f32 %v676_v23, %v521_v55 }
  0x8c   :  { %1194 = vst [vmem:[#allocation5 + $0x78] sm:$0xff] %v1277_v54  ;;  %v891_v32 = vsel %vm816_vm8, %v1556_v45, 0.0  ;;  %v892_v60 = vsel %vm817_vm9, %v1559_v46, 0.0  ;;  %vm165_vm12 = vcmp.eq.s32.totalorder %v1441_v40, %v1470_v59  ;;  %v239_v1 = vsel %vm164_vm11, %v1482_v62, 0.0 }
  0x8d   :  { %v955_v17 = vadd.f32 %v891_v32, %v739_v15  ;;  %v240_v2 = vsel %vm165_vm12, %v1485_v63, 0.0  ;;  %vm383_vm10 = vcmp.eq.s32.totalorder %v1441_v40, %v1479_v61  ;;  %v956_v35 = vadd.f32 %v892_v60, %v740_v57 }
  0x8e   :  { %vm384_vm13 = vcmp.eq.s32.totalorder %v1441_v40, %v1491_v0  ;;  %v458_v3 = vsel %vm383_vm10, %v1508_v7, 0.0  ;;  %vm602_vm14 = vcmp.eq.s32.totalorder %v1441_v40, %v1515_v9  ;;  %vm603_vm15 = vcmp.eq.s32.totalorder %v1441_v40, %v1518_v12 }
  0x8f   :  { %v459_v26 = vsel %vm384_vm13, %v1511_v8, 0.0  ;;  %v522_v4 = vadd.f32 %v458_v3, %v239_v1  ;;  %v677_v6 = vsel %vm602_vm14, %v1542_v36, 0.0  ;;  %v1278_v13 = vpack.c.bf16 %v956_v35, %v955_v17 }
  0x90   :  { %v523_v28 = vadd.f32 %v459_v26, %v240_v2  ;;  %v678_v29 = vsel %vm603_vm15, %v1545_v37, 0.0  ;;  %vm818_vm0 = vcmp.eq.s32.totalorder %v1441_v40, %v1524_v20  ;;  %vm819_vm1 = vcmp.eq.s32.totalorder %v1441_v40, %v1527_v21 }
  0x91   :  { %v741_v33 = vadd.f32 %v677_v6, %v522_v4  ;;  %v893_v30 = vsel %vm818_vm0, %v1556_v45, 0.0  ;;  %vm166_vm2 = vcmp.eq.s32.totalorder %v1444_v41, %v1467_v58  ;;  %1195 = vst [vmem:[#allocation5 + $0x80] sm:$0xff] %v1278_v13  ;;  %v894_v24 = vsel %vm819_vm1, %v1559_v46, 0.0 }
  0x92   :  { %v742_v31 = vadd.f32 %v678_v29, %v523_v28  ;;  %vm167_vm3 = vcmp.eq.s32.totalorder %v1444_v41, %v1470_v59  ;;  %v241_v14 = vsel %vm166_vm2, %v1482_v62, 0.0  ;;  %vm385_vm5 = vcmp.eq.s32.totalorder %v1444_v41, %v1479_v61 }
  0x93   :  { %v957_v22 = vadd.f32 %v893_v30, %v741_v33  ;;  %v242_v38 = vsel %vm167_vm3, %v1485_v63, 0.0  ;;  %vm386_vm4 = vcmp.eq.s32.totalorder %v1444_v41, %v1491_v0  ;;  %v460_v39 = vsel %vm385_vm5, %v1508_v7, 0.0 }
  0x94   :  { %v958_v40 = vadd.f32 %v894_v24, %v742_v31  ;;  %v461_v16 = vsel %vm386_vm4, %v1511_v8, 0.0  ;;  %vm604_vm6 = vcmp.eq.s32.totalorder %v1444_v41, %v1515_v9  ;;  %v524_v18 = vadd.f32 %v460_v39, %v241_v14 }
  0x95   :  { %v525_v44 = vadd.f32 %v461_v16, %v242_v38  ;;  %vm605_vm7 = vcmp.eq.s32.totalorder %v1444_v41, %v1518_v12  ;;  %v679_v47 = vsel %vm604_vm6, %v1542_v36, 0.0  ;;  %vm820_vm8 = vcmp.eq.s32.totalorder %v1444_v41, %v1524_v20 }
  0x96   :  { %v1279_v27 = vpack.c.bf16 %v958_v40, %v957_v22  ;;  %v680_v48 = vsel %vm605_vm7, %v1545_v37, 0.0  ;;  %vm821_vm9 = vcmp.eq.s32.totalorder %v1444_v41, %v1527_v21  ;;  %v743_v49 = vadd.f32 %v679_v47, %v524_v18 }
  0x97   :  { %v744_v51 = vadd.f32 %v680_v48, %v525_v44  ;;  %v895_v34 = vsel %vm820_vm8, %v1556_v45, 0.0  ;;  %v896_v25 = vsel %vm821_vm9, %v1559_v46, 0.0  ;;  %vm168_vm11 = vcmp.eq.s32.totalorder %v1447_v42, %v1467_v58 }
  0x98   :  { %1196 = vst [vmem:[#allocation5 + $0x88] sm:$0xff] %v1279_v27  ;;  %vm169_vm12 = vcmp.eq.s32.totalorder %v1447_v42, %v1470_v59  ;;  %vm387_vm10 = vcmp.eq.s32.totalorder %v1447_v42, %v1479_v61  ;;  %vm388_vm13 = vcmp.eq.s32.totalorder %v1447_v42, %v1491_v0  ;;  %v959_v41 = vadd.f32 %v895_v34, %v743_v49 }
  0x99   :  { %v960_v52 = vadd.f32 %v896_v25, %v744_v51  ;;  %v243_v53 = vsel %vm168_vm11, %v1482_v62, 0.0  ;;  %v244_v10 = vsel %vm169_vm12, %v1485_v63, 0.0  ;;  %v462_v11 = vsel %vm387_vm10, %v1508_v7, 0.0 }
  0x9a   :  { %v463_v54 = vsel %vm388_vm13, %v1511_v8, 0.0  ;;  %vm606_vm14 = vcmp.eq.s32.totalorder %v1447_v42, %v1515_v9  ;;  %vm607_vm15 = vcmp.eq.s32.totalorder %v1447_v42, %v1518_v12  ;;  %v526_v19 = vadd.f32 %v462_v11, %v243_v53 }
  0x9b   :  { %v1280_v55 = vpack.c.bf16 %v960_v52, %v959_v41  ;;  %v527_v23 = vadd.f32 %v463_v54, %v244_v10  ;;  %v681_v15 = vsel %vm606_vm14, %v1542_v36, 0.0  ;;  %v682_v57 = vsel %vm607_vm15, %v1545_v37, 0.0 }
  0x9c   :  { %vm822_vm0 = vcmp.eq.s32.totalorder %v1447_v42, %v1524_v20  ;;  %vm823_vm1 = vcmp.eq.s32.totalorder %v1447_v42, %v1527_v21  ;;  %vm170_vm2 = vcmp.eq.s32.totalorder %v1450_v43, %v1467_v58  ;;  %v745_v32 = vadd.f32 %v681_v15, %v526_v19 }
  0x9d   :  { %1197 = vst [vmem:[#allocation5 + $0x90] sm:$0xff] %v1280_v55  ;;  %v746_v60 = vadd.f32 %v682_v57, %v527_v23  ;;  %v897_v17 = vsel %vm822_vm0, %v1556_v45, 0.0  ;;  %v898_v1 = vsel %vm823_vm1, %v1559_v46, 0.0  ;;  %vm171_vm3 = vcmp.eq.s32.totalorder %v1450_v43, %v1470_v59 }
  0x9e   :  { %v245_v2 = vsel %vm170_vm2, %v1482_v62, 0.0  ;;  %vm389_vm5 = vcmp.eq.s32.totalorder %v1450_v43, %v1479_v61  ;;  %vm390_vm4 = vcmp.eq.s32.totalorder %v1450_v43, %v1491_v0  ;;  %v961_v42 = vadd.f32 %v897_v17, %v745_v32 }
  0x9f   :  { %v962_v35 = vadd.f32 %v898_v1, %v746_v60  ;;  %v246_v3 = vsel %vm171_vm3, %v1485_v63, 0.0  ;;  %v464_v26 = vsel %vm389_vm5, %v1508_v7, 0.0  ;;  %v465_v4 = vsel %vm390_vm4, %v1511_v8, 0.0 }
  0xa0   :  { %v528_v6 = vadd.f32 %v464_v26, %v245_v2  ;;  %vm608_vm6 = vcmp.eq.s32.totalorder %v1450_v43, %v1515_v9  ;;  %vm609_vm7 = vcmp.eq.s32.totalorder %v1450_v43, %v1518_v12  ;;  %v529_v28 = vadd.f32 %v465_v4, %v246_v3 }
  0xa1   :  { %v1281_v13 = vpack.c.bf16 %v962_v35, %v961_v42  ;;  %v683_v29 = vsel %vm608_vm6, %v1542_v36, 0.0  ;;  %v684_v33 = vsel %vm609_vm7, %v1545_v37, 0.0  ;;  %vm824_vm8 = vcmp.eq.s32.totalorder %v1450_v43, %v1524_v20 }
  0xa2   :  { %v747_v30 = vadd.f32 %v683_v29, %v528_v6  ;;  %vm825_vm9 = vcmp.eq.s32.totalorder %v1450_v43, %v1527_v21  ;;  %vm172_vm11 = vcmp.eq.s32.totalorder %v1457_v50, %v1467_v58  ;;  %v748_v31 = vadd.f32 %v684_v33, %v529_v28 }
  0xa3   :  { %1198 = vst [vmem:[#allocation5 + $0x98] sm:$0xff] %v1281_v13  ;;  %v899_v24 = vsel %vm824_vm8, %v1556_v45, 0.0  ;;  %v900_v14 = vsel %vm825_vm9, %v1559_v46, 0.0  ;;  %vm173_vm12 = vcmp.eq.s32.totalorder %v1457_v50, %v1470_v59  ;;  %v247_v38 = vsel %vm172_vm11, %v1482_v62, 0.0 }
  0xa4   :  { %v963_v22 = vadd.f32 %v899_v24, %v747_v30  ;;  %v248_v40 = vsel %vm173_vm12, %v1485_v63, 0.0  ;;  %vm391_vm10 = vcmp.eq.s32.totalorder %v1457_v50, %v1479_v61  ;;  %v964_v43 = vadd.f32 %v900_v14, %v748_v31 }
  0xa5   :  { %vm392_vm13 = vcmp.eq.s32.totalorder %v1457_v50, %v1491_v0  ;;  %v466_v39 = vsel %vm391_vm10, %v1508_v7, 0.0  ;;  %vm610_vm14 = vcmp.eq.s32.totalorder %v1457_v50, %v1515_v9  ;;  %vm611_vm15 = vcmp.eq.s32.totalorder %v1457_v50, %v1518_v12 }
  0xa6   :  { %v467_v16 = vsel %vm392_vm13, %v1511_v8, 0.0  ;;  %v530_v18 = vadd.f32 %v466_v39, %v247_v38  ;;  %v685_v44 = vsel %vm610_vm14, %v1542_v36, 0.0  ;;  %v1282_v47 = vpack.c.bf16 %v964_v43, %v963_v22 }
  0xa7   :  { %v531_v27 = vadd.f32 %v467_v16, %v248_v40  ;;  %v686_v48 = vsel %vm611_vm15, %v1545_v37, 0.0  ;;  %vm826_vm0 = vcmp.eq.s32.totalorder %v1457_v50, %v1524_v20  ;;  %vm827_vm1 = vcmp.eq.s32.totalorder %v1457_v50, %v1527_v21 }
  0xa8   :  { %v749_v49 = vadd.f32 %v685_v44, %v530_v18  ;;  %v901_v51 = vsel %vm826_vm0, %v1556_v45, 0.0  ;;  %vm174_vm2 = vcmp.eq.s32.totalorder %v1464_v56, %v1467_v58  ;;  %1199 = vst [vmem:[#allocation5 + $0xa0] sm:$0xff] %v1282_v47  ;;  %v902_v25 = vsel %vm827_vm1, %v1559_v46, 0.0 }
  0xa9   :  { %v750_v34 = vadd.f32 %v686_v48, %v531_v27  ;;  %vm175_vm3 = vcmp.eq.s32.totalorder %v1464_v56, %v1470_v59  ;;  %v249_v41 = vsel %vm174_vm2, %v1482_v62, 0.0  ;;  %vm393_vm5 = vcmp.eq.s32.totalorder %v1464_v56, %v1479_v61 }
  0xaa   :  { %v965_v52 = vadd.f32 %v901_v51, %v749_v49  ;;  %v250_v53 = vsel %vm175_vm3, %v1485_v63, 0.0  ;;  %vm394_vm4 = vcmp.eq.s32.totalorder %v1464_v56, %v1491_v0  ;;  %v468_v10 = vsel %vm393_vm5, %v1508_v7, 0.0 }
  0xab   :  { %v966_v50 = vadd.f32 %v902_v25, %v750_v34  ;;  %v469_v11 = vsel %vm394_vm4, %v1511_v8, 0.0  ;;  %vm612_vm6 = vcmp.eq.s32.totalorder %v1464_v56, %v1515_v9  ;;  %v532_v54 = vadd.f32 %v468_v10, %v249_v41 }
  0xac   :  { %v533_v55 = vadd.f32 %v469_v11, %v250_v53  ;;  %vm613_vm7 = vcmp.eq.s32.totalorder %v1464_v56, %v1518_v12  ;;  %v687_v19 = vsel %vm612_vm6, %v1542_v36, 0.0  ;;  %vm828_vm8 = vcmp.eq.s32.totalorder %v1464_v56, %v1524_v20 }
  0xad   :  { %v1283_v23 = vpack.c.bf16 %v966_v50, %v965_v52  ;;  %v688_v15 = vsel %vm613_vm7, %v1545_v37, 0.0  ;;  %vm829_vm9 = vcmp.eq.s32.totalorder %v1464_v56, %v1527_v21  ;;  %v751_v57 = vadd.f32 %v687_v19, %v532_v54 }
  0xae   :  { %v752_v32 = vadd.f32 %v688_v15, %v533_v55  ;;  %v903_v60 = vsel %vm828_vm8, %v1556_v45, 0.0  ;;  %v904_v17 = vsel %vm829_vm9, %v1559_v46, 0.0  ;;  %v69_v1 = vadd.s32 184, %v1384_v5 }
  0xaf   :  { %1200 = vst [vmem:[#allocation5 + $0xa8] sm:$0xff] %v1283_v23  ;;  %v70_v2 = vadd.s32 192, %v1384_v5  ;;  %v2093_v42 = vadd.s32 200, %v1384_v5  ;;  %v2096_v35 = vadd.s32 208, %v1384_v5  ;;  %v967_v3 = vadd.f32 %v903_v60, %v751_v57 }
  0xb0   :  { %v968_v26 = vadd.f32 %v904_v17, %v752_v32  ;;  %v2099_v56 = vadd.s32 216, %v1384_v5  ;;  %v2102_v4 = vadd.s32 224, %v1384_v5  ;;  %vm176_vm11 = vcmp.eq.s32.totalorder %v69_v1, %v1467_v58 }
  0xb1   :  { %vm177_vm12 = vcmp.eq.s32.totalorder %v69_v1, %v1470_v59  ;;  %vm395_vm10 = vcmp.eq.s32.totalorder %v69_v1, %v1479_v61  ;;  %vm396_vm13 = vcmp.eq.s32.totalorder %v69_v1, %v1491_v0  ;;  %v251_v13 = vsel %vm176_vm11, %v1482_v62, 0.0 }
  0xb2   :  { %v1284_v6 = vpack.c.bf16 %v968_v26, %v967_v3  ;;  %v252_v28 = vsel %vm177_vm12, %v1485_v63, 0.0  ;;  %v470_v29 = vsel %vm395_vm10, %v1508_v7, 0.0  ;;  %v471_v33 = vsel %vm396_vm13, %v1511_v8, 0.0 }
  0xb3   :  { %v534_v30 = vadd.f32 %v470_v29, %v251_v13  ;;  %vm614_vm14 = vcmp.eq.s32.totalorder %v69_v1, %v1515_v9  ;;  %vm615_vm15 = vcmp.eq.s32.totalorder %v69_v1, %v1518_v12  ;;  %v535_v31 = vadd.f32 %v471_v33, %v252_v28 }
  0xb4   :  { %1201 = vst [vmem:[#allocation5 + $0xb0] sm:$0xff] %v1284_v6  ;;  %v689_v24 = vsel %vm614_vm14, %v1542_v36, 0.0  ;;  %v690_v14 = vsel %vm615_vm15, %v1545_v37, 0.0  ;;  %vm830_vm0 = vcmp.eq.s32.totalorder %v69_v1, %v1524_v20  ;;  %vm831_vm1 = vcmp.eq.s32.totalorder %v69_v1, %v1527_v21 }
  0xb5   :  { %v753_v22 = vadd.f32 %v689_v24, %v534_v30  ;;  %v905_v38 = vsel %vm830_vm0, %v1556_v45, 0.0  ;;  %vm178_vm2 = vcmp.eq.s32.totalorder %v70_v2, %v1467_v58  ;;  %v754_v40 = vadd.f32 %v690_v14, %v535_v31 }
  0xb6   :  { %v906_v43 = vsel %vm831_vm1, %v1559_v46, 0.0  ;;  %vm179_vm3 = vcmp.eq.s32.totalorder %v70_v2, %v1470_v59  ;;  %v253_v39 = vsel %vm178_vm2, %v1482_v62, 0.0  ;;  %vm397_vm5 = vcmp.eq.s32.totalorder %v70_v2, %v1479_v61 }
  0xb7   :  { %v969_v16 = vadd.f32 %v905_v38, %v753_v22  ;;  %v254_v18 = vsel %vm179_vm3, %v1485_v63, 0.0  ;;  %vm398_vm4 = vcmp.eq.s32.totalorder %v70_v2, %v1491_v0  ;;  %v970_v44 = vadd.f32 %v906_v43, %v754_v40 }
  0xb8   :  { %v472_v47 = vsel %vm397_vm5, %v1508_v7, 0.0  ;;  %v473_v27 = vsel %vm398_vm4, %v1511_v8, 0.0  ;;  %vm616_vm6 = vcmp.eq.s32.totalorder %v70_v2, %v1515_v9  ;;  %vm617_vm7 = vcmp.eq.s32.totalorder %v70_v2, %v1518_v12 }
  0xb9   :  { %v536_v48 = vadd.f32 %v472_v47, %v253_v39  ;;  %v537_v49 = vadd.f32 %v473_v27, %v254_v18  ;;  %v691_v51 = vsel %vm616_vm6, %v1542_v36, 0.0  ;;  %v1285_v34 = vpack.c.bf16 %v970_v44, %v969_v16 }
  0xba   :  { %v692_v25 = vsel %vm617_vm7, %v1545_v37, 0.0  ;;  %vm832_vm8 = vcmp.eq.s32.totalorder %v70_v2, %v1524_v20  ;;  %vm833_vm9 = vcmp.eq.s32.totalorder %v70_v2, %v1527_v21  ;;  %vm180_vm11 = vcmp.eq.s32.totalorder %v2093_v42, %v1467_v58 }
  0xbb   :  { %v755_v41 = vadd.f32 %v691_v51, %v536_v48  ;;  %v756_v52 = vadd.f32 %v692_v25, %v537_v49  ;;  %v907_v53 = vsel %vm832_vm8, %v1556_v45, 0.0  ;;  %v908_v50 = vsel %vm833_vm9, %v1559_v46, 0.0  ;;  %1202 = vst [vmem:[#allocation5 + $0xb8] sm:$0xff] %v1285_v34 }
  0xbc   :  { %vm181_vm12 = vcmp.eq.s32.totalorder %v2093_v42, %v1470_v59  ;;  %vm399_vm10 = vcmp.eq.s32.totalorder %v2093_v42, %v1479_v61  ;;  %vm400_vm13 = vcmp.eq.s32.totalorder %v2093_v42, %v1491_v0  ;;  %v255_v54 = vsel %vm180_vm11, %v1482_v62, 0.0 }
  0xbd   :  { %v971_v10 = vadd.f32 %v907_v53, %v755_v41  ;;  %v972_v11 = vadd.f32 %v908_v50, %v756_v52  ;;  %v256_v55 = vsel %vm181_vm12, %v1485_v63, 0.0  ;;  %v474_v19 = vsel %vm399_vm10, %v1508_v7, 0.0 }
  0xbe   :  { %v475_v23 = vsel %vm400_vm13, %v1511_v8, 0.0  ;;  %vm618_vm14 = vcmp.eq.s32.totalorder %v2093_v42, %v1515_v9  ;;  %vm619_vm15 = vcmp.eq.s32.totalorder %v2093_v42, %v1518_v12  ;;  %v538_v57 = vadd.f32 %v474_v19, %v255_v54 }
  0xbf   :  { %v1286_v15 = vpack.c.bf16 %v972_v11, %v971_v10  ;;  %v539_v32 = vadd.f32 %v475_v23, %v256_v55  ;;  %v693_v60 = vsel %vm618_vm14, %v1542_v36, 0.0  ;;  %v694_v17 = vsel %vm619_vm15, %v1545_v37, 0.0 }
  0xc0   :  { %vm834_vm0 = vcmp.eq.s32.totalorder %v2093_v42, %v1524_v20  ;;  %vm835_vm1 = vcmp.eq.s32.totalorder %v2093_v42, %v1527_v21  ;;  %vm182_vm2 = vcmp.eq.s32.totalorder %v2096_v35, %v1467_v58  ;;  %v757_v1 = vadd.f32 %v693_v60, %v538_v57 }
  0xc1   :  { %1203 = vst [vmem:[#allocation5 + $0xc0] sm:$0xff] %v1286_v15  ;;  %v758_v2 = vadd.f32 %v694_v17, %v539_v32  ;;  %v909_v3 = vsel %vm834_vm0, %v1556_v45, 0.0  ;;  %v910_v26 = vsel %vm835_vm1, %v1559_v46, 0.0  ;;  %vm183_vm3 = vcmp.eq.s32.totalorder %v2096_v35, %v1470_v59 }
  0xc2   :  { %v257_v6 = vsel %vm182_vm2, %v1482_v62, 0.0  ;;  %vm401_vm5 = vcmp.eq.s32.totalorder %v2096_v35, %v1479_v61  ;;  %vm402_vm4 = vcmp.eq.s32.totalorder %v2096_v35, %v1491_v0  ;;  %v973_v42 = vadd.f32 %v909_v3, %v757_v1 }
  0xc3   :  { %v974_v13 = vadd.f32 %v910_v26, %v758_v2  ;;  %v258_v28 = vsel %vm183_vm3, %v1485_v63, 0.0  ;;  %v476_v29 = vsel %vm401_vm5, %v1508_v7, 0.0  ;;  %v477_v33 = vsel %vm402_vm4, %v1511_v8, 0.0 }
  0xc4   :  { %v540_v30 = vadd.f32 %v476_v29, %v257_v6  ;;  %vm620_vm6 = vcmp.eq.s32.totalorder %v2096_v35, %v1515_v9  ;;  %vm621_vm7 = vcmp.eq.s32.totalorder %v2096_v35, %v1518_v12  ;;  %v541_v24 = vadd.f32 %v477_v33, %v258_v28 }
  0xc5   :  { %v1287_v31 = vpack.c.bf16 %v974_v13, %v973_v42  ;;  %v695_v14 = vsel %vm620_vm6, %v1542_v36, 0.0  ;;  %v696_v22 = vsel %vm621_vm7, %v1545_v37, 0.0  ;;  %vm836_vm8 = vcmp.eq.s32.totalorder %v2096_v35, %v1524_v20 }
  0xc6   :  { %v759_v38 = vadd.f32 %v695_v14, %v540_v30  ;;  %vm837_vm9 = vcmp.eq.s32.totalorder %v2096_v35, %v1527_v21  ;;  %vm184_vm11 = vcmp.eq.s32.totalorder %v2099_v56, %v1467_v58  ;;  %v760_v40 = vadd.f32 %v696_v22, %v541_v24 }
  0xc7   :  { %1204 = vst [vmem:[#allocation5 + $0xc8] sm:$0xff] %v1287_v31  ;;  %v911_v43 = vsel %vm836_vm8, %v1556_v45, 0.0  ;;  %v912_v39 = vsel %vm837_vm9, %v1559_v46, 0.0  ;;  %vm185_vm12 = vcmp.eq.s32.totalorder %v2099_v56, %v1470_v59  ;;  %v259_v18 = vsel %vm184_vm11, %v1482_v62, 0.0 }
  0xc8   :  { %v975_v16 = vadd.f32 %v911_v43, %v759_v38  ;;  %v260_v44 = vsel %vm185_vm12, %v1485_v63, 0.0  ;;  %vm403_vm10 = vcmp.eq.s32.totalorder %v2099_v56, %v1479_v61  ;;  %v976_v35 = vadd.f32 %v912_v39, %v760_v40 }
  0xc9   :  { %vm404_vm13 = vcmp.eq.s32.totalorder %v2099_v56, %v1491_v0  ;;  %v478_v47 = vsel %vm403_vm10, %v1508_v7, 0.0  ;;  %vm622_vm14 = vcmp.eq.s32.totalorder %v2099_v56, %v1515_v9  ;;  %vm623_vm15 = vcmp.eq.s32.totalorder %v2099_v56, %v1518_v12 }
  0xca   :  { %v479_v27 = vsel %vm404_vm13, %v1511_v8, 0.0  ;;  %v542_v48 = vadd.f32 %v478_v47, %v259_v18  ;;  %v697_v49 = vsel %vm622_vm14, %v1542_v36, 0.0  ;;  %v1288_v51 = vpack.c.bf16 %v976_v35, %v975_v16 }
  0xcb   :  { %v543_v34 = vadd.f32 %v479_v27, %v260_v44  ;;  %v698_v25 = vsel %vm623_vm15, %v1545_v37, 0.0  ;;  %vm838_vm0 = vcmp.eq.s32.totalorder %v2099_v56, %v1524_v20  ;;  %vm839_vm1 = vcmp.eq.s32.totalorder %v2099_v56, %v1527_v21 }
  0xcc   :  { %v761_v41 = vadd.f32 %v697_v49, %v542_v48  ;;  %v913_v52 = vsel %vm838_vm0, %v1556_v45, 0.0  ;;  %vm186_vm2 = vcmp.eq.s32.totalorder %v2102_v4, %v1467_v58  ;;  %1205 = vst [vmem:[#allocation5 + $0xd0] sm:$0xff] %v1288_v51  ;;  %v914_v50 = vsel %vm839_vm1, %v1559_v46, 0.0 }
  0xcd   :  { %v762_v53 = vadd.f32 %v698_v25, %v543_v34  ;;  %vm187_vm3 = vcmp.eq.s32.totalorder %v2102_v4, %v1470_v59  ;;  %v261_v10 = vsel %vm186_vm2, %v1482_v62, 0.0  ;;  %vm405_vm5 = vcmp.eq.s32.totalorder %v2102_v4, %v1479_v61 }
  0xce   :  { %v977_v11 = vadd.f32 %v913_v52, %v761_v41  ;;  %v262_v54 = vsel %vm187_vm3, %v1485_v63, 0.0  ;;  %vm406_vm4 = vcmp.eq.s32.totalorder %v2102_v4, %v1491_v0  ;;  %v480_v55 = vsel %vm405_vm5, %v1508_v7, 0.0 }
  0xcf   :  { %v978_v56 = vadd.f32 %v914_v50, %v762_v53  ;;  %v481_v19 = vsel %vm406_vm4, %v1511_v8, 0.0  ;;  %vm624_vm6 = vcmp.eq.s32.totalorder %v2102_v4, %v1515_v9  ;;  %v544_v23 = vadd.f32 %v480_v55, %v261_v10 }
  0xd0   :  { %v545_v15 = vadd.f32 %v481_v19, %v262_v54  ;;  %vm625_vm7 = vcmp.eq.s32.totalorder %v2102_v4, %v1518_v12  ;;  %v699_v57 = vsel %vm624_vm6, %v1542_v36, 0.0  ;;  %vm840_vm8 = vcmp.eq.s32.totalorder %v2102_v4, %v1524_v20 }
  0xd1   :  { %v1289_v32 = vpack.c.bf16 %v978_v56, %v977_v11  ;;  %v700_v60 = vsel %vm625_vm7, %v1545_v37, 0.0  ;;  %vm841_vm9 = vcmp.eq.s32.totalorder %v2102_v4, %v1527_v21  ;;  %v763_v17 = vadd.f32 %v699_v57, %v544_v23 }
  0xd2   :  { %v764_v1 = vadd.f32 %v700_v60, %v545_v15  ;;  %v915_v2 = vsel %vm840_vm8, %v1556_v45, 0.0  ;;  %v916_v3 = vsel %vm841_vm9, %v1559_v46, 0.0  ;;  %v75_v26 = vadd.s32 232, %v1384_v5 }
  0xd3   :  { %1206 = vst [vmem:[#allocation5 + $0xd8] sm:$0xff] %v1289_v32  ;;  %v979_v6 = vadd.f32 %v915_v2, %v763_v17  ;;  %v76_v13 = vadd.s32 240, %v1384_v5  ;;  %v2235_v28 = vadd.s32 248, %v1384_v5 }
  0xd4   :  { %v980_v42 = vadd.f32 %v916_v3, %v764_v1  ;;  %vm188_vm11 = vcmp.eq.s32.totalorder %v75_v26, %v1467_v58  ;;  %vm189_vm12 = vcmp.eq.s32.totalorder %v75_v26, %v1470_v59  ;;  %vm407_vm10 = vcmp.eq.s32.totalorder %v75_v26, %v1479_v61 }
  0xd5   :  { %vm408_vm13 = vcmp.eq.s32.totalorder %v75_v26, %v1491_v0  ;;  %v263_v29 = vsel %vm188_vm11, %v1482_v62, 0.0  ;;  %v264_v33 = vsel %vm189_vm12, %v1485_v63, 0.0  ;;  %v482_v30 = vsel %vm407_vm10, %v1508_v7, 0.0 }
  0xd6   :  { %v1290_v4 = vpack.c.bf16 %v980_v42, %v979_v6  ;;  %v483_v31 = vsel %vm408_vm13, %v1511_v8, 0.0  ;;  %v546_v24 = vadd.f32 %v482_v30, %v263_v29  ;;  %vm626_vm14 = vcmp.eq.s32.totalorder %v75_v26, %v1515_v9 }
  0xd7   :  { %vm627_vm15 = vcmp.eq.s32.totalorder %v75_v26, %v1518_v12  ;;  %v547_v5 = vadd.f32 %v483_v31, %v264_v33  ;;  %v701_v14 = vsel %vm626_vm14, %v1542_v36, 0.0  ;;  %vm842_vm0 = vcmp.eq.s32.totalorder %v75_v26, %v1524_v20 }
  0xd8   :  { %1207 = vst [vmem:[#allocation5 + $0xe0] sm:$0xff] %v1290_v4  ;;  %v702_v22 = vsel %vm627_vm15, %v1545_v37, 0.0  ;;  %v765_v38 = vadd.f32 %v701_v14, %v546_v24  ;;  %vm843_vm1 = vcmp.eq.s32.totalorder %v75_v26, %v1527_v21  ;;  %v917_v40 = vsel %vm842_vm0, %v1556_v45, 0.0 }
  0xd9   :  { %vm190_vm2 = vcmp.eq.s32.totalorder %v76_v13, %v1467_v58  ;;  %v766_v43 = vadd.f32 %v702_v22, %v547_v5  ;;  %v918_v39 = vsel %vm843_vm1, %v1559_v46, 0.0  ;;  %vm191_vm3 = vcmp.eq.s32.totalorder %v76_v13, %v1470_v59 }
  0xda   :  { %v265_v16 = vsel %vm190_vm2, %v1482_v62, 0.0  ;;  %v981_v18 = vadd.f32 %v917_v40, %v765_v38  ;;  %v266_v44 = vsel %vm191_vm3, %v1485_v63, 0.0  ;;  %vm409_vm5 = vcmp.eq.s32.totalorder %v76_v13, %v1479_v61 }
  0xdb   :  { %vm410_vm4 = vcmp.eq.s32.totalorder %v76_v13, %v1491_v0  ;;  %v982_v35 = vadd.f32 %v918_v39, %v766_v43  ;;  %v484_v47 = vsel %vm409_vm5, %v1508_v7, 0.0  ;;  %vm628_vm6 = vcmp.eq.s32.totalorder %v76_v13, %v1515_v9 }
  0xdc   :  { %v485_v27 = vsel %vm410_vm4, %v1511_v8, 0.0  ;;  %v548_v48 = vadd.f32 %v484_v47, %v265_v16  ;;  %vm629_vm7 = vcmp.eq.s32.totalorder %v76_v13, %v1518_v12  ;;  %v703_v51 = vsel %vm628_vm6, %v1542_v36, 0.0 }
  0xdd   :  { %v549_v49 = vadd.f32 %v485_v27, %v266_v44  ;;  %v1291_v34 = vpack.c.bf16 %v982_v35, %v981_v18  ;;  %v704_v25 = vsel %vm629_vm7, %v1545_v37, 0.0  ;;  %vm844_vm8 = vcmp.eq.s32.totalorder %v76_v13, %v1524_v20 }
  0xde   :  { %vm845_vm9 = vcmp.eq.s32.totalorder %v76_v13, %v1527_v21  ;;  %v767_v41 = vadd.f32 %v703_v51, %v548_v48  ;;  %v919_v53 = vsel %vm844_vm8, %v1556_v45, 0.0  ;;  %vm192_vm11 = vcmp.eq.s32.totalorder %v2235_v28, %v1467_v58 }
  0xdf   :  { %v768_v52 = vadd.f32 %v704_v25, %v549_v49  ;;  %v920_v50 = vsel %vm845_vm9, %v1559_v46, 0.0  ;;  %1208 = vst [vmem:[#allocation5 + $0xe8] sm:$0xff] %v1291_v34  ;;  %vm193_vm12 = vcmp.eq.s32.totalorder %v2235_v28, %v1470_v59  ;;  %vm411_vm10 = vcmp.eq.s32.totalorder %v2235_v28, %v1479_v61 }
  0xe0   :  { %vm412_vm13 = vcmp.eq.s32.totalorder %v2235_v28, %v1491_v0  ;;  %v983_v10 = vadd.f32 %v919_v53, %v767_v41  ;;  %v267_v54 = vsel %vm192_vm11, %v1482_v62, 0.0  ;;  %v268_v56 = vsel %vm193_vm12, %v1485_v63, 0.0 }
  0xe1   :  { %v984_v11 = vadd.f32 %v920_v50, %v768_v52  ;;  %v486_v55 = vsel %vm411_vm10, %v1508_v7, 0.0  ;;  %v487_v19 = vsel %vm412_vm13, %v1511_v8, 0.0  ;;  %vm630_vm14 = vcmp.eq.s32.totalorder %v2235_v28, %v1515_v9 }
  0xe2   :  { %vm631_vm15 = vcmp.eq.s32.totalorder %v2235_v28, %v1518_v12  ;;  %v550_v59 = vadd.f32 %v486_v55, %v267_v54  ;;  %v551_v61 = vadd.f32 %v487_v19, %v268_v56  ;;  %v705_v0 = vsel %vm630_vm14, %v1542_v36, 0.0 }
  0xe3   :  { %v1292_v58 = vpack.c.bf16 %v984_v11, %v983_v10  ;;  %v706_v23 = vsel %vm631_vm15, %v1545_v37, 0.0  ;;  %vm846_vm0 = vcmp.eq.s32.totalorder %v2235_v28, %v1524_v20  ;;  %vm847_vm1 = vcmp.eq.s32.totalorder %v2235_v28, %v1527_v21 }
  0xe4   :  { %v769_v62 = vadd.f32 %v705_v0, %v550_v59  ;;  %v770_v63 = vadd.f32 %v706_v23, %v551_v61  ;;  %v921_v7 = vsel %vm846_vm0, %v1556_v45, 0.0  ;;  %v922_v8 = vsel %vm847_vm1, %v1559_v46, 0.0 }
  0xe5   :  { %1209 = vst [vmem:[#allocation5 + $0xf0] sm:$0xff] %v1292_v58 }
  0xe6   :  { %v985_v9 = vadd.f32 %v921_v7, %v769_v62  ;;  %v986_v12 = vadd.f32 %v922_v8, %v770_v63 }
  0xe8   :  { %v1293_v36 = vpack.c.bf16 %v986_v12, %v985_v9 }
  0xea   :  { %1210 = vst [vmem:[#allocation5 + $0xf8] sm:$0xff] %v1293_v36 }
  0xeb   :  { %1335 = shalt.err (!%p1332_p12)
}
  0xec   :  { %s1336_s26 = scalar_lea.hbm %s2307_s2, 4096 }
  0xed   :  { %p1337_p13 = scmp.ne.s32.totalorder %s2307_s2, %s1336_s26  ;;  %p1340_p0 = scmp.lt.u32.totalorder %s1336_s26, %s2307_s2 }
  0xef   :  { %p1342_p1 = pnand %p1340_p0, %p1337_p13 }
  0xf1   :  { %1345 = shalt.err (!%p1342_p1)
}
  0xf2   :  { %s1352_s3 = smov 128   ;;  %s1353_s4 = smov 8  }
  0xf3   :  { %1222 = dma.vmem_to_hbm [thread:$0]  %s1217_s1, 4096, %s2307_s2, [#allocation4], %s1352_s3, %s1352_s3, %s1353_s4  }
  0xf4   :  { %1348 = dma.done.wait [#allocation4], 4096  }
  0xf5   :  { %1349 = vsyncadd [#allocation4], 4294963200 }
  0xf6   :  { %1226 = vsyncpa [#allocation3], 1 }
  0xf7   :  { %1227 = vsyncpa [#allocation4], 1 }

</bundles_post_ra>
